<compile_context>
chip_gen: v7x
topology: tpu7x:2x2x1
jax: 0.10.0
libtpu: 0.0.40
codegen_flags: <defaults>
</compile_context>

<pallas_src>
import functools

import jax
import jax.numpy as jnp
from jax.experimental import pallas as pl
from jax.experimental.pallas import tpu as pltpu


def _round_up(x, m):
    return (x + m - 1) // m * m


# ----------------------------------------------------------------------------
# Fused per-level head kernel (one batch element per grid step).
# ----------------------------------------------------------------------------
def _fused_head_kernel(x_ref, mask_ref, w_tw_ref, b_tw_ref, w_cc_ref, b_cc_ref,
                       w_bx_ref, b_bx_ref, scale_ref,
                       o_cc_ref, o_bx_ref,
                       col1_ref, col2_ref, *, cin, h, w):
    # Flat spatial geometry:
    #   padded grid: q x p, g = q*p flat positions
    #   e = p + 1  : largest |flat offset| of a 3x3 tap
    #   tower output lanes: n1 = g + 2e  (lane j <-> grid position j - e)
    #   head  output lanes: g            (lane j <-> grid position j)
    p = w + 2
    q = h + 2
    g = q * p
    e = p + 1
    n1 = g + 2 * e

    # ---- im2col of the input (source layout: [2e zeros | grid | 2e zeros]) --
    x = x_ref[0]                                      # (cin, g + 4e), bf16
    for ky in range(3):
        for kx in range(3):
            off = (ky - 1) * p + (kx - 1)
            tap = ky * 3 + kx
            col1_ref[tap * cin:(tap + 1) * cin, :] = x[:, off + e:off + e + n1]

    # ---- fused cls_tower + bbox_tower: one K = 9*cin MXU matmul -------------
    tw = jnp.dot(w_tw_ref[...], col1_ref[...],
                 preferred_element_type=jnp.float32)       # (2*cin, n1) f32
    tw = jnp.maximum(tw + b_tw_ref[...], 0.0)
    # Zero everything that is not a real interior pixel, so the tower output
    # behaves as a zero-padded input for the 3x3 head convolutions.
    tw = (tw * mask_ref[...]).astype(jnp.bfloat16)
    ct = tw[:cin, :]      # cls tower activations
    bt = tw[cin:, :]      # bbox tower activations

    def head(src, w_ref, b_ref):
        # src: (cin, n1) bf16, zero outside real interior pixels.
        for ky in range(3):
            for kx in range(3):
                off = (ky - 1) * p + (kx - 1)
                tap = ky * 3 + kx
                col2_ref[tap * cin:(tap + 1) * cin, :] = (
                    src[:, off + e:off + e + g])
        # Output covers all g padded-grid lanes; only interior lanes are used.
        return jnp.dot(w_ref[...], col2_ref[...],
                       preferred_element_type=jnp.float32) + b_ref[...]

    # fused cls_logits + centerness head
    o_cc_ref[0] = head(ct, w_cc_ref, b_cc_ref)
    # bbox head with per-level scale (runtime SMEM scalar)
    o_bx_ref[0] = head(bt, w_bx_ref, b_bx_ref) * scale_ref[0]


def _interior_mask(h, w):
    """1.0 on lanes of the extended tower layout that are real pixels."""
    p, q = w + 2, h + 2
    e = p + 1
    m = jnp.zeros((q, p), jnp.float32)
    m = m.at[1:h + 1, 1:w + 1].set(1.0)
    m = m.reshape(1, q * p)
    return jnp.pad(m, ((0, 0), (e, e)))          # (1, g + 2e)


def _run_head_level(x_nchw, packed, scale):
    """Runs the fused head for one FPN level. Returns (cls, bbox, ctr), NCHW."""
    n, cin, h, w = x_nchw.shape
    p, q = w + 2, h + 2
    g = q * p
    e = p + 1
    n1 = g + 2 * e
    ncc_p = packed["w_cc"].shape[0]
    nbx_p = packed["w_bx"].shape[0]
    nine_cin = 9 * cin

    # Zero-extended flat input: [2e zeros | zero-padded grid | 2e zeros].
    xg = jnp.pad(x_nchw, ((0, 0), (0, 0), (1, 1), (1, 1)))
    xf = xg.reshape(n, cin, g)
    src = jnp.pad(xf, ((0, 0), (0, 0), (2 * e, 2 * e))).astype(jnp.bfloat16)

    mask = _interior_mask(h, w)
    scale_arr = jnp.reshape(scale, (1,)).astype(jnp.float32)

    kernel = functools.partial(_fused_head_kernel, cin=cin, h=h, w=w)
    out_cc, out_bx = pl.pallas_call(
        kernel,
        out_shape=(jax.ShapeDtypeStruct((n, ncc_p, g), jnp.float32),
                   jax.ShapeDtypeStruct((n, nbx_p, g), jnp.float32)),
        grid=(n,),
        in_specs=[
            pl.BlockSpec((1, cin, g + 4 * e), lambda i: (i, 0, 0)),
            pl.BlockSpec((1, n1), lambda i: (0, 0)),
            pl.BlockSpec((2 * cin, nine_cin), lambda i: (0, 0)),
            pl.BlockSpec((2 * cin, 1), lambda i: (0, 0)),
            pl.BlockSpec((ncc_p, nine_cin), lambda i: (0, 0)),
            pl.BlockSpec((ncc_p, 1), lambda i: (0, 0)),
            pl.BlockSpec((nbx_p, nine_cin), lambda i: (0, 0)),
            pl.BlockSpec((nbx_p, 1), lambda i: (0, 0)),
            pl.BlockSpec(memory_space=pltpu.MemorySpace.SMEM),
        ],
        out_specs=(pl.BlockSpec((1, ncc_p, g), lambda i: (i, 0, 0)),
                   pl.BlockSpec((1, nbx_p, g), lambda i: (i, 0, 0))),
        scratch_shapes=[pltpu.VMEM((nine_cin, n1), jnp.bfloat16),
                        pltpu.VMEM((nine_cin, g), jnp.bfloat16)],
        compiler_params=pltpu.CompilerParams(
            dimension_semantics=("parallel",)),
    )(src, mask, packed["w_tw"], packed["b_tw"], packed["w_cc"],
      packed["b_cc"], packed["w_bx"], packed["b_bx"], scale_arr)

    nc = packed["num_classes"]
    out_cc = out_cc.reshape(n, ncc_p, q, p)[:, :, 1:h + 1, 1:w + 1]
    out_bx = out_bx.reshape(n, nbx_p, q, p)[:, :, 1:h + 1, 1:w + 1]
    cls_logits = out_cc[:, :nc]
    centerness = out_cc[:, nc:nc + 1]
    bbox_pred = out_bx[:, :4]
    return cls_logits, bbox_pred, centerness


# ----------------------------------------------------------------------------
# Synthetic AVOD/FCOS-style head parameters + packing for the fused kernel.
# ----------------------------------------------------------------------------
def init_head_params(key, in_channels, num_classes, num_levels):
    keys = jax.random.split(key, 5)

    def conv_init(k, cin, cout):
        wt = jax.random.normal(k, (3, 3, cin, cout), jnp.float32) * 0.05
        b = jnp.zeros((cout,), jnp.float32)
        return wt, b

    return {
        "cls_tower": conv_init(keys[0], in_channels, in_channels),
        "bbox_tower": conv_init(keys[1], in_channels, in_channels),
        "cls_logits": conv_init(keys[2], in_channels, num_classes),
        "bbox_pred": conv_init(keys[3], in_channels, 4),
        "centerness": conv_init(keys[4], in_channels, 1),
        "scales": [1.0 + 0.1 * i for i in range(num_levels)],
    }


def _flatten_w(wt):
    # (3, 3, cin, cout) -> (cout, 9*cin); column index = (ky*3 + kx)*cin + ci,
    # matching the im2col row order used inside the kernel.
    _, _, cin, cout = wt.shape
    return jnp.transpose(wt, (3, 0, 1, 2)).reshape(cout, 9 * cin)


def _pad_rows(a, rows):
    extra = rows - a.shape[0]
    if extra > 0:
        a = jnp.pad(a, ((0, extra),) + ((0, 0),) * (a.ndim - 1))
    return a


def pack_head_params(params, num_classes):
    """Pre-packs weights: fused towers, fused cls+ctr head, bf16, 8-row pad."""
    cin = params["cls_tower"][0].shape[2]
    w_tw = jnp.concatenate([_flatten_w(params["cls_tower"][0]),
                            _flatten_w(params["bbox_tower"][0])], axis=0)
    b_tw = jnp.concatenate([params["cls_tower"][1],
                            params["bbox_tower"][1]])[:, None]
    ncc_p = _round_up(num_classes + 1, 8)
    w_cc = _pad_rows(jnp.concatenate([_flatten_w(params["cls_logits"][0]),
                                      _flatten_w(params["centerness"][0])],
                                     axis=0), ncc_p)
    b_cc = _pad_rows(jnp.concatenate([params["cls_logits"][1],
                                      params["centerness"][1]])[:, None],
                     ncc_p)
    nbx_p = _round_up(4, 8)
    w_bx = _pad_rows(_flatten_w(params["bbox_pred"][0]), nbx_p)
    b_bx = _pad_rows(params["bbox_pred"][1][:, None], nbx_p)
    return {
        "w_tw": w_tw.astype(jnp.bfloat16),
        "b_tw": b_tw.astype(jnp.float32),
        "w_cc": w_cc.astype(jnp.bfloat16),
        "b_cc": b_cc.astype(jnp.float32),
        "w_bx": w_bx.astype(jnp.bfloat16),
        "b_bx": b_bx.astype(jnp.float32),
        "scales": jnp.asarray(params["scales"], jnp.float32),
        "num_classes": num_classes,
        "cin": cin,
    }


# ----------------------------------------------------------------------------
# compute_locations_per_level: data independent -> plain jnp (no kernel).
# ----------------------------------------------------------------------------
def compute_locations_per_level(h, w, stride):
    shifts_x = jnp.arange(0, w * stride, stride, dtype=jnp.float32)
    shifts_y = jnp.arange(0, h * stride, stride, dtype=jnp.float32)
    shift_y, shift_x = jnp.meshgrid(shifts_y, shifts_x, indexing="ij")
    return jnp.stack([shift_x.reshape(-1), shift_y.reshape(-1)],
                     axis=1) + stride // 2


# ----------------------------------------------------------------------------
# IENet_RPN forward (inference path).
# ----------------------------------------------------------------------------
def ienet_rpn_forward(features_nchw, fpn_strides, packed_params):
    cls_all, box_all, ctr_all, locations = [], [], [], []
    for level, feat in enumerate(features_nchw):
        cls_l, box_l, ctr_l = _run_head_level(
            feat, packed_params, packed_params["scales"][level])
        cls_all.append(cls_l)
        box_all.append(box_l)
        ctr_all.append(ctr_l)
        h, w = feat.shape[-2:]
        locations.append(compute_locations_per_level(h, w, fpn_strides[level]))
    prediction = (cls_all, box_all, ctr_all)
    # TODO(synk): box_selector_test / loss_evaluator are external builders not
    # in the module source; returning raw head outputs + locations.
    return (prediction, locations), {}


# ----------------------------------------------------------------------------
# Pure-JAX f32 reference of the head (for validation only).
# ----------------------------------------------------------------------------
def _ref_head_level(x, params, scale):
    def conv(z, wb, relu=False):
        wt, b = wb
        y = jax.lax.conv_general_dilated(
            z, wt, window_strides=(1, 1), padding="SAME",
            dimension_numbers=("NCHW", "HWIO", "NCHW"))
        y = y + b.reshape(1, -1, 1, 1)
        return jnp.maximum(y, 0.0) if relu else y

    ct = conv(x, params["cls_tower"], relu=True)
    bt = conv(x, params["bbox_tower"], relu=True)
    cls_logits = conv(ct, params["cls_logits"])
    centerness = conv(ct, params["centerness"])
    bbox_pred = conv(bt, params["bbox_pred"]) * scale
    return cls_logits, bbox_pred, centerness


if __name__ == "__main__":
    key = jax.random.PRNGKey(0)
    k1, k2, kp = jax.random.split(key, 3)

    batch, in_channels, num_classes = 2, 32, 3
    fpn_strides = [8, 16]
    features = [
        jax.random.normal(k1, (batch, in_channels, 16, 16), jnp.float32),
        jax.random.normal(k2, (batch, in_channels, 8, 8), jnp.float32),
    ]

    params = init_head_params(kp, in_channels, num_classes,
                              num_levels=len(features))
    packed = pack_head_params(params, num_classes)

    (prediction, locations), losses = ienet_rpn_forward(
        features, fpn_strides, packed)
    jax.block_until_ready((prediction, locations))

    cls_all, box_all, ctr_all = prediction
    assert cls_all[0].shape == (batch, num_classes, 16, 16)
    assert box_all[1].shape == (batch, 4, 8, 8)
    assert ctr_all[0].shape == (batch, 1, 16, 16)
    assert locations[0].shape == (16 * 16, 2)
    assert locations[1].shape == (8 * 8, 2)
    assert float(locations[0][0, 0]) == 4.0  # stride 8 -> first center at 4
    assert losses == {}

    # Numerical check against a pure-JAX f32 reference (bf16 MXU tolerance).
    for lvl, feat in enumerate(features):
        ref_cls, ref_box, ref_ctr = _ref_head_level(
            feat, params, params["scales"][lvl])
        for got, ref in ((cls_all[lvl], ref_cls), (box_all[lvl], ref_box),
                         (ctr_all[lvl], ref_ctr)):
            err = float(jnp.max(jnp.abs(got - ref)))
            assert err < 0.25, f"level {lvl}: max abs err {err}"

    print("KERNEL_OK")
</pallas_src>

<mosaic_0001>
module attributes {stable_mosaic.version = 11 : i64} {
  func.func @_fused_head_kernel(%arg0: i32, %arg1: memref<1x32x400xbf16, #tpu.memory_space<vmem>>, %arg2: memref<1x362xf32, #tpu.memory_space<vmem>>, %arg3: memref<64x288xbf16, #tpu.memory_space<vmem>>, %arg4: memref<64x1xf32, #tpu.memory_space<vmem>>, %arg5: memref<8x288xbf16, #tpu.memory_space<vmem>>, %arg6: memref<8x1xf32, #tpu.memory_space<vmem>>, %arg7: memref<8x288xbf16, #tpu.memory_space<vmem>>, %arg8: memref<8x1xf32, #tpu.memory_space<vmem>>, %arg9: memref<1xf32, #tpu.memory_space<smem>>, %arg10: memref<1x8x324xf32, #tpu.memory_space<vmem>>, %arg11: memref<1x8x324xf32, #tpu.memory_space<vmem>>, %arg12: memref<288x362xbf16, #tpu.memory_space<vmem>>, %arg13: memref<288x324xbf16, #tpu.memory_space<vmem>>) attributes {dimension_semantics = [#tpu.dimension_semantics<parallel>], iteration_bounds = array<i64: 2>, scalar_prefetch = 0 : i64, scratch_operands = 2 : i64, tpu.core_type = #tpu.core_type<tc>, window_params = [{transform_indices = @transform_0, window_bounds = array<i64: 1, 32, 400>}, {pipeline_mode = #tpu.pipeline_mode<synchronous>, transform_indices = @transform_1, window_bounds = array<i64: 1, 362>}, {pipeline_mode = #tpu.pipeline_mode<synchronous>, transform_indices = @transform_2, window_bounds = array<i64: 64, 288>}, {pipeline_mode = #tpu.pipeline_mode<synchronous>, transform_indices = @transform_3, window_bounds = array<i64: 64, 1>}, {pipeline_mode = #tpu.pipeline_mode<synchronous>, transform_indices = @transform_4, window_bounds = array<i64: 8, 288>}, {pipeline_mode = #tpu.pipeline_mode<synchronous>, transform_indices = @transform_5, window_bounds = array<i64: 8, 1>}, {pipeline_mode = #tpu.pipeline_mode<synchronous>, transform_indices = @transform_6, window_bounds = array<i64: 8, 288>}, {pipeline_mode = #tpu.pipeline_mode<synchronous>, transform_indices = @transform_7, window_bounds = array<i64: 8, 1>}, {transform_indices = @transform_8, window_bounds = array<i64: 1>}, {transform_indices = @transform_9, window_bounds = array<i64: 1, 8, 324>}, {transform_indices = @transform_10, window_bounds = array<i64: 1, 8, 324>}]} {
    %c0 = arith.constant 0 : index
    %c0_0 = arith.constant 0 : index
    %c0_1 = arith.constant 0 : index
    %0 = vector.load %arg1[%c0, %c0_0, %c0_1] : memref<1x32x400xbf16, #tpu.memory_space<vmem>>, vector<1x32x400xbf16>
    %1 = vector.shape_cast %0 : vector<1x32x400xbf16> to vector<32x400xbf16>
    %2 = vector.extract_strided_slice %1 {offsets = [0, 0], sizes = [32, 362], strides = [1, 1]} : vector<32x400xbf16> to vector<32x362xbf16>
    %c0_2 = arith.constant 0 : index
    %c0_3 = arith.constant 0 : index
    %3 = vector.load %arg12[%c0_2, %c0_3] : memref<288x362xbf16, #tpu.memory_space<vmem>>, vector<32x362xbf16>
    tpu.vector_store %arg12[%c0_2, %c0_3], %2 {strides = array<i32>} : memref<288x362xbf16, #tpu.memory_space<vmem>>, vector<32x362xbf16>,
    %4 = vector.extract_strided_slice %1 {offsets = [0, 1], sizes = [32, 362], strides = [1, 1]} : vector<32x400xbf16> to vector<32x362xbf16>
    %c32 = arith.constant 32 : index
    %c0_4 = arith.constant 0 : index
    %5 = vector.load %arg12[%c32, %c0_4] : memref<288x362xbf16, #tpu.memory_space<vmem>>, vector<32x362xbf16>
    tpu.vector_store %arg12[%c32, %c0_4], %4 {strides = array<i32>} : memref<288x362xbf16, #tpu.memory_space<vmem>>, vector<32x362xbf16>,
    %6 = vector.extract_strided_slice %1 {offsets = [0, 2], sizes = [32, 362], strides = [1, 1]} : vector<32x400xbf16> to vector<32x362xbf16>
    %c64 = arith.constant 64 : index
    %c0_5 = arith.constant 0 : index
    %7 = vector.load %arg12[%c64, %c0_5] : memref<288x362xbf16, #tpu.memory_space<vmem>>, vector<32x362xbf16>
    tpu.vector_store %arg12[%c64, %c0_5], %6 {strides = array<i32>} : memref<288x362xbf16, #tpu.memory_space<vmem>>, vector<32x362xbf16>,
    %8 = vector.extract_strided_slice %1 {offsets = [0, 18], sizes = [32, 362], strides = [1, 1]} : vector<32x400xbf16> to vector<32x362xbf16>
    %c96 = arith.constant 96 : index
    %c0_6 = arith.constant 0 : index
    %9 = vector.load %arg12[%c96, %c0_6] : memref<288x362xbf16, #tpu.memory_space<vmem>>, vector<32x362xbf16>
    tpu.vector_store %arg12[%c96, %c0_6], %8 {strides = array<i32>} : memref<288x362xbf16, #tpu.memory_space<vmem>>, vector<32x362xbf16>,
    %10 = vector.extract_strided_slice %1 {offsets = [0, 19], sizes = [32, 362], strides = [1, 1]} : vector<32x400xbf16> to vector<32x362xbf16>
    %c128 = arith.constant 128 : index
    %c0_7 = arith.constant 0 : index
    %11 = vector.load %arg12[%c128, %c0_7] : memref<288x362xbf16, #tpu.memory_space<vmem>>, vector<32x362xbf16>
    tpu.vector_store %arg12[%c128, %c0_7], %10 {strides = array<i32>} : memref<288x362xbf16, #tpu.memory_space<vmem>>, vector<32x362xbf16>,
    %12 = vector.extract_strided_slice %1 {offsets = [0, 20], sizes = [32, 362], strides = [1, 1]} : vector<32x400xbf16> to vector<32x362xbf16>
    %c160 = arith.constant 160 : index
    %c0_8 = arith.constant 0 : index
    %13 = vector.load %arg12[%c160, %c0_8] : memref<288x362xbf16, #tpu.memory_space<vmem>>, vector<32x362xbf16>
    tpu.vector_store %arg12[%c160, %c0_8], %12 {strides = array<i32>} : memref<288x362xbf16, #tpu.memory_space<vmem>>, vector<32x362xbf16>,
    %14 = vector.extract_strided_slice %1 {offsets = [0, 36], sizes = [32, 362], strides = [1, 1]} : vector<32x400xbf16> to vector<32x362xbf16>
    %c192 = arith.constant 192 : index
    %c0_9 = arith.constant 0 : index
    %15 = vector.load %arg12[%c192, %c0_9] : memref<288x362xbf16, #tpu.memory_space<vmem>>, vector<32x362xbf16>
    tpu.vector_store %arg12[%c192, %c0_9], %14 {strides = array<i32>} : memref<288x362xbf16, #tpu.memory_space<vmem>>, vector<32x362xbf16>,
    %16 = vector.extract_strided_slice %1 {offsets = [0, 37], sizes = [32, 362], strides = [1, 1]} : vector<32x400xbf16> to vector<32x362xbf16>
    %c224 = arith.constant 224 : index
    %c0_10 = arith.constant 0 : index
    %17 = vector.load %arg12[%c224, %c0_10] : memref<288x362xbf16, #tpu.memory_space<vmem>>, vector<32x362xbf16>
    tpu.vector_store %arg12[%c224, %c0_10], %16 {strides = array<i32>} : memref<288x362xbf16, #tpu.memory_space<vmem>>, vector<32x362xbf16>,
    %18 = vector.extract_strided_slice %1 {offsets = [0, 38], sizes = [32, 362], strides = [1, 1]} : vector<32x400xbf16> to vector<32x362xbf16>
    %c256 = arith.constant 256 : index
    %c0_11 = arith.constant 0 : index
    %19 = vector.load %arg12[%c256, %c0_11] : memref<288x362xbf16, #tpu.memory_space<vmem>>, vector<32x362xbf16>
    tpu.vector_store %arg12[%c256, %c0_11], %18 {strides = array<i32>} : memref<288x362xbf16, #tpu.memory_space<vmem>>, vector<32x362xbf16>,
    %c0_12 = arith.constant 0 : index
    %c0_13 = arith.constant 0 : index
    %20 = vector.load %arg3[%c0_12, %c0_13] : memref<64x288xbf16, #tpu.memory_space<vmem>>, vector<64x288xbf16>
    %c0_14 = arith.constant 0 : index
    %c0_15 = arith.constant 0 : index
    %21 = vector.load %arg12[%c0_14, %c0_15] : memref<288x362xbf16, #tpu.memory_space<vmem>>, vector<288x362xbf16>
    %cst = arith.constant dense<0.000000e+00> : vector<64x362xf32>
    %22 = tpu.matmul %20, %21, %cst {dimension_numbers = #tpu.dot_dimension_numbers<[1], [0], [0], [1], [0, 0, 1, 1], [], []>} : vector<64x288xbf16>, vector<288x362xbf16>, vector<64x362xf32> -> vector<64x362xf32>
    %c0_16 = arith.constant 0 : index
    %c0_17 = arith.constant 0 : index
    %23 = vector.load %arg4[%c0_16, %c0_17] : memref<64x1xf32, #tpu.memory_space<vmem>>, vector<64x1xf32>
    %24 = vector.broadcast %23 : vector<64x1xf32> to vector<64x362xf32>
    %25 = arith.addf %22, %24 : vector<64x362xf32>
    %cst_18 = arith.constant 0.000000e+00 : f32
    %26 = vector.broadcast %cst_18 : f32 to vector<64x362xf32>
    %27 = arith.maximumf %25, %26 : vector<64x362xf32>
    %c0_19 = arith.constant 0 : index
    %c0_20 = arith.constant 0 : index
    %28 = vector.load %arg2[%c0_19, %c0_20] : memref<1x362xf32, #tpu.memory_space<vmem>>, vector<1x362xf32>
    %29 = vector.broadcast %28 : vector<1x362xf32> to vector<64x362xf32>
    %30 = arith.mulf %27, %29 : vector<64x362xf32>
    %31 = arith.truncf %30 : vector<64x362xf32> to vector<64x362xbf16>
    %32 = vector.extract_strided_slice %31 {offsets = [0, 0], sizes = [32, 362], strides = [1, 1]} : vector<64x362xbf16> to vector<32x362xbf16>
    %33 = vector.extract_strided_slice %31 {offsets = [32, 0], sizes = [32, 362], strides = [1, 1]} : vector<64x362xbf16> to vector<32x362xbf16>
    %34 = vector.extract_strided_slice %32 {offsets = [0, 0], sizes = [32, 324], strides = [1, 1]} : vector<32x362xbf16> to vector<32x324xbf16>
    %c0_21 = arith.constant 0 : index
    %c0_22 = arith.constant 0 : index
    %35 = vector.load %arg13[%c0_21, %c0_22] : memref<288x324xbf16, #tpu.memory_space<vmem>>, vector<32x324xbf16>
    tpu.vector_store %arg13[%c0_21, %c0_22], %34 {strides = array<i32>} : memref<288x324xbf16, #tpu.memory_space<vmem>>, vector<32x324xbf16>,
    %36 = vector.extract_strided_slice %32 {offsets = [0, 1], sizes = [32, 324], strides = [1, 1]} : vector<32x362xbf16> to vector<32x324xbf16>
    %c32_23 = arith.constant 32 : index
    %c0_24 = arith.constant 0 : index
    %37 = vector.load %arg13[%c32_23, %c0_24] : memref<288x324xbf16, #tpu.memory_space<vmem>>, vector<32x324xbf16>
    tpu.vector_store %arg13[%c32_23, %c0_24], %36 {strides = array<i32>} : memref<288x324xbf16, #tpu.memory_space<vmem>>, vector<32x324xbf16>,
    %38 = vector.extract_strided_slice %32 {offsets = [0, 2], sizes = [32, 324], strides = [1, 1]} : vector<32x362xbf16> to vector<32x324xbf16>
    %c64_25 = arith.constant 64 : index
    %c0_26 = arith.constant 0 : index
    %39 = vector.load %arg13[%c64_25, %c0_26] : memref<288x324xbf16, #tpu.memory_space<vmem>>, vector<32x324xbf16>
    tpu.vector_store %arg13[%c64_25, %c0_26], %38 {strides = array<i32>} : memref<288x324xbf16, #tpu.memory_space<vmem>>, vector<32x324xbf16>,
    %40 = vector.extract_strided_slice %32 {offsets = [0, 18], sizes = [32, 324], strides = [1, 1]} : vector<32x362xbf16> to vector<32x324xbf16>
    %c96_27 = arith.constant 96 : index
    %c0_28 = arith.constant 0 : index
    %41 = vector.load %arg13[%c96_27, %c0_28] : memref<288x324xbf16, #tpu.memory_space<vmem>>, vector<32x324xbf16>
    tpu.vector_store %arg13[%c96_27, %c0_28], %40 {strides = array<i32>} : memref<288x324xbf16, #tpu.memory_space<vmem>>, vector<32x324xbf16>,
    %42 = vector.extract_strided_slice %32 {offsets = [0, 19], sizes = [32, 324], strides = [1, 1]} : vector<32x362xbf16> to vector<32x324xbf16>
    %c128_29 = arith.constant 128 : index
    %c0_30 = arith.constant 0 : index
    %43 = vector.load %arg13[%c128_29, %c0_30] : memref<288x324xbf16, #tpu.memory_space<vmem>>, vector<32x324xbf16>
    tpu.vector_store %arg13[%c128_29, %c0_30], %42 {strides = array<i32>} : memref<288x324xbf16, #tpu.memory_space<vmem>>, vector<32x324xbf16>,
    %44 = vector.extract_strided_slice %32 {offsets = [0, 20], sizes = [32, 324], strides = [1, 1]} : vector<32x362xbf16> to vector<32x324xbf16>
    %c160_31 = arith.constant 160 : index
    %c0_32 = arith.constant 0 : index
    %45 = vector.load %arg13[%c160_31, %c0_32] : memref<288x324xbf16, #tpu.memory_space<vmem>>, vector<32x324xbf16>
    tpu.vector_store %arg13[%c160_31, %c0_32], %44 {strides = array<i32>} : memref<288x324xbf16, #tpu.memory_space<vmem>>, vector<32x324xbf16>,
    %46 = vector.extract_strided_slice %32 {offsets = [0, 36], sizes = [32, 324], strides = [1, 1]} : vector<32x362xbf16> to vector<32x324xbf16>
    %c192_33 = arith.constant 192 : index
    %c0_34 = arith.constant 0 : index
    %47 = vector.load %arg13[%c192_33, %c0_34] : memref<288x324xbf16, #tpu.memory_space<vmem>>, vector<32x324xbf16>
    tpu.vector_store %arg13[%c192_33, %c0_34], %46 {strides = array<i32>} : memref<288x324xbf16, #tpu.memory_space<vmem>>, vector<32x324xbf16>,
    %48 = vector.extract_strided_slice %32 {offsets = [0, 37], sizes = [32, 324], strides = [1, 1]} : vector<32x362xbf16> to vector<32x324xbf16>
    %c224_35 = arith.constant 224 : index
    %c0_36 = arith.constant 0 : index
    %49 = vector.load %arg13[%c224_35, %c0_36] : memref<288x324xbf16, #tpu.memory_space<vmem>>, vector<32x324xbf16>
    tpu.vector_store %arg13[%c224_35, %c0_36], %48 {strides = array<i32>} : memref<288x324xbf16, #tpu.memory_space<vmem>>, vector<32x324xbf16>,
    %50 = vector.extract_strided_slice %32 {offsets = [0, 38], sizes = [32, 324], strides = [1, 1]} : vector<32x362xbf16> to vector<32x324xbf16>
    %c256_37 = arith.constant 256 : index
    %c0_38 = arith.constant 0 : index
    %51 = vector.load %arg13[%c256_37, %c0_38] : memref<288x324xbf16, #tpu.memory_space<vmem>>, vector<32x324xbf16>
    tpu.vector_store %arg13[%c256_37, %c0_38], %50 {strides = array<i32>} : memref<288x324xbf16, #tpu.memory_space<vmem>>, vector<32x324xbf16>,
    %c0_39 = arith.constant 0 : index
    %c0_40 = arith.constant 0 : index
    %52 = vector.load %arg5[%c0_39, %c0_40] : memref<8x288xbf16, #tpu.memory_space<vmem>>, vector<8x288xbf16>
    %c0_41 = arith.constant 0 : index
    %c0_42 = arith.constant 0 : index
    %53 = vector.load %arg13[%c0_41, %c0_42] : memref<288x324xbf16, #tpu.memory_space<vmem>>, vector<288x324xbf16>
    %cst_43 = arith.constant dense<0.000000e+00> : vector<8x324xf32>
    %54 = tpu.matmul %52, %53, %cst_43 {dimension_numbers = #tpu.dot_dimension_numbers<[1], [0], [0], [1], [0, 0, 1, 1], [], []>} : vector<8x288xbf16>, vector<288x324xbf16>, vector<8x324xf32> -> vector<8x324xf32>
    %c0_44 = arith.constant 0 : index
    %c0_45 = arith.constant 0 : index
    %55 = vector.load %arg6[%c0_44, %c0_45] : memref<8x1xf32, #tpu.memory_space<vmem>>, vector<8x1xf32>
    %56 = vector.broadcast %55 : vector<8x1xf32> to vector<8x324xf32>
    %57 = arith.addf %54, %56 : vector<8x324xf32>
    %c0_46 = arith.constant 0 : index
    %c0_47 = arith.constant 0 : index
    %c0_48 = arith.constant 0 : index
    %58 = vector.load %arg10[%c0_46, %c0_47, %c0_48] : memref<1x8x324xf32, #tpu.memory_space<vmem>>, vector<1x8x324xf32>
    %59 = vector.shape_cast %58 : vector<1x8x324xf32> to vector<8x324xf32>
    %60 = vector.shape_cast %57 : vector<8x324xf32> to vector<1x8x324xf32>
    tpu.vector_store %arg10[%c0_46, %c0_47, %c0_48], %60 {strides = array<i32>} : memref<1x8x324xf32, #tpu.memory_space<vmem>>, vector<1x8x324xf32>,
    %61 = vector.extract_strided_slice %33 {offsets = [0, 0], sizes = [32, 324], strides = [1, 1]} : vector<32x362xbf16> to vector<32x324xbf16>
    %c0_49 = arith.constant 0 : index
    %c0_50 = arith.constant 0 : index
    %62 = vector.load %arg13[%c0_49, %c0_50] : memref<288x324xbf16, #tpu.memory_space<vmem>>, vector<32x324xbf16>
    tpu.vector_store %arg13[%c0_49, %c0_50], %61 {strides = array<i32>} : memref<288x324xbf16, #tpu.memory_space<vmem>>, vector<32x324xbf16>,
    %63 = vector.extract_strided_slice %33 {offsets = [0, 1], sizes = [32, 324], strides = [1, 1]} : vector<32x362xbf16> to vector<32x324xbf16>
    %c32_51 = arith.constant 32 : index
    %c0_52 = arith.constant 0 : index
    %64 = vector.load %arg13[%c32_51, %c0_52] : memref<288x324xbf16, #tpu.memory_space<vmem>>, vector<32x324xbf16>
    tpu.vector_store %arg13[%c32_51, %c0_52], %63 {strides = array<i32>} : memref<288x324xbf16, #tpu.memory_space<vmem>>, vector<32x324xbf16>,
    %65 = vector.extract_strided_slice %33 {offsets = [0, 2], sizes = [32, 324], strides = [1, 1]} : vector<32x362xbf16> to vector<32x324xbf16>
    %c64_53 = arith.constant 64 : index
    %c0_54 = arith.constant 0 : index
    %66 = vector.load %arg13[%c64_53, %c0_54] : memref<288x324xbf16, #tpu.memory_space<vmem>>, vector<32x324xbf16>
    tpu.vector_store %arg13[%c64_53, %c0_54], %65 {strides = array<i32>} : memref<288x324xbf16, #tpu.memory_space<vmem>>, vector<32x324xbf16>,
    %67 = vector.extract_strided_slice %33 {offsets = [0, 18], sizes = [32, 324], strides = [1, 1]} : vector<32x362xbf16> to vector<32x324xbf16>
    %c96_55 = arith.constant 96 : index
    %c0_56 = arith.constant 0 : index
    %68 = vector.load %arg13[%c96_55, %c0_56] : memref<288x324xbf16, #tpu.memory_space<vmem>>, vector<32x324xbf16>
    tpu.vector_store %arg13[%c96_55, %c0_56], %67 {strides = array<i32>} : memref<288x324xbf16, #tpu.memory_space<vmem>>, vector<32x324xbf16>,
    %69 = vector.extract_strided_slice %33 {offsets = [0, 19], sizes = [32, 324], strides = [1, 1]} : vector<32x362xbf16> to vector<32x324xbf16>
    %c128_57 = arith.constant 128 : index
    %c0_58 = arith.constant 0 : index
    %70 = vector.load %arg13[%c128_57, %c0_58] : memref<288x324xbf16, #tpu.memory_space<vmem>>, vector<32x324xbf16>
    tpu.vector_store %arg13[%c128_57, %c0_58], %69 {strides = array<i32>} : memref<288x324xbf16, #tpu.memory_space<vmem>>, vector<32x324xbf16>,
    %71 = vector.extract_strided_slice %33 {offsets = [0, 20], sizes = [32, 324], strides = [1, 1]} : vector<32x362xbf16> to vector<32x324xbf16>
    %c160_59 = arith.constant 160 : index
    %c0_60 = arith.constant 0 : index
    %72 = vector.load %arg13[%c160_59, %c0_60] : memref<288x324xbf16, #tpu.memory_space<vmem>>, vector<32x324xbf16>
    tpu.vector_store %arg13[%c160_59, %c0_60], %71 {strides = array<i32>} : memref<288x324xbf16, #tpu.memory_space<vmem>>, vector<32x324xbf16>,
    %73 = vector.extract_strided_slice %33 {offsets = [0, 36], sizes = [32, 324], strides = [1, 1]} : vector<32x362xbf16> to vector<32x324xbf16>
    %c192_61 = arith.constant 192 : index
    %c0_62 = arith.constant 0 : index
    %74 = vector.load %arg13[%c192_61, %c0_62] : memref<288x324xbf16, #tpu.memory_space<vmem>>, vector<32x324xbf16>
    tpu.vector_store %arg13[%c192_61, %c0_62], %73 {strides = array<i32>} : memref<288x324xbf16, #tpu.memory_space<vmem>>, vector<32x324xbf16>,
    %75 = vector.extract_strided_slice %33 {offsets = [0, 37], sizes = [32, 324], strides = [1, 1]} : vector<32x362xbf16> to vector<32x324xbf16>
    %c224_63 = arith.constant 224 : index
    %c0_64 = arith.constant 0 : index
    %76 = vector.load %arg13[%c224_63, %c0_64] : memref<288x324xbf16, #tpu.memory_space<vmem>>, vector<32x324xbf16>
    tpu.vector_store %arg13[%c224_63, %c0_64], %75 {strides = array<i32>} : memref<288x324xbf16, #tpu.memory_space<vmem>>, vector<32x324xbf16>,
    %77 = vector.extract_strided_slice %33 {offsets = [0, 38], sizes = [32, 324], strides = [1, 1]} : vector<32x362xbf16> to vector<32x324xbf16>
    %c256_65 = arith.constant 256 : index
    %c0_66 = arith.constant 0 : index
    %78 = vector.load %arg13[%c256_65, %c0_66] : memref<288x324xbf16, #tpu.memory_space<vmem>>, vector<32x324xbf16>
    tpu.vector_store %arg13[%c256_65, %c0_66], %77 {strides = array<i32>} : memref<288x324xbf16, #tpu.memory_space<vmem>>, vector<32x324xbf16>,
    %c0_67 = arith.constant 0 : index
    %c0_68 = arith.constant 0 : index
    %79 = vector.load %arg7[%c0_67, %c0_68] : memref<8x288xbf16, #tpu.memory_space<vmem>>, vector<8x288xbf16>
    %c0_69 = arith.constant 0 : index
    %c0_70 = arith.constant 0 : index
    %80 = vector.load %arg13[%c0_69, %c0_70] : memref<288x324xbf16, #tpu.memory_space<vmem>>, vector<288x324xbf16>
    %cst_71 = arith.constant dense<0.000000e+00> : vector<8x324xf32>
    %81 = tpu.matmul %79, %80, %cst_71 {dimension_numbers = #tpu.dot_dimension_numbers<[1], [0], [0], [1], [0, 0, 1, 1], [], []>} : vector<8x288xbf16>, vector<288x324xbf16>, vector<8x324xf32> -> vector<8x324xf32>
    %c0_72 = arith.constant 0 : index
    %c0_73 = arith.constant 0 : index
    %82 = vector.load %arg8[%c0_72, %c0_73] : memref<8x1xf32, #tpu.memory_space<vmem>>, vector<8x1xf32>
    %83 = vector.broadcast %82 : vector<8x1xf32> to vector<8x324xf32>
    %84 = arith.addf %81, %83 : vector<8x324xf32>
    %c0_74 = arith.constant 0 : index
    %85 = memref.load %arg9[%c0_74] : memref<1xf32, #tpu.memory_space<smem>>
    %86 = vector.broadcast %85 : f32 to vector<8x324xf32>
    %87 = arith.mulf %84, %86 : vector<8x324xf32>
    %c0_75 = arith.constant 0 : index
    %c0_76 = arith.constant 0 : index
    %c0_77 = arith.constant 0 : index
    %88 = vector.load %arg11[%c0_75, %c0_76, %c0_77] : memref<1x8x324xf32, #tpu.memory_space<vmem>>, vector<1x8x324xf32>
    %89 = vector.shape_cast %88 : vector<1x8x324xf32> to vector<8x324xf32>
    %90 = vector.shape_cast %87 : vector<8x324xf32> to vector<1x8x324xf32>
    tpu.vector_store %arg11[%c0_75, %c0_76, %c0_77], %90 {strides = array<i32>} : memref<1x8x324xf32, #tpu.memory_space<vmem>>, vector<1x8x324xf32>,
    return
  }
  func.func @transform_0(%arg0: i32) -> (i32, i32, i32) {
    %c0_i32 = arith.constant 0 : i32
    %c0_i32_0 = arith.constant 0 : i32
    %c0_i32_1 = arith.constant 0 : i32
    return %arg0, %c0_i32, %c0_i32_0 : i32, i32, i32
  }
  func.func @transform_1(%arg0: i32) -> (i32, i32) {
    %c0_i32 = arith.constant 0 : i32
    %c0_i32_0 = arith.constant 0 : i32
    %c0_i32_1 = arith.constant 0 : i32
    return %c0_i32, %c0_i32_0 : i32, i32
  }
  func.func @transform_2(%arg0: i32) -> (i32, i32) {
    %c0_i32 = arith.constant 0 : i32
    %c0_i32_0 = arith.constant 0 : i32
    %c0_i32_1 = arith.constant 0 : i32
    return %c0_i32, %c0_i32_0 : i32, i32
  }
  func.func @transform_3(%arg0: i32) -> (i32, i32) {
    %c0_i32 = arith.constant 0 : i32
    %c0_i32_0 = arith.constant 0 : i32
    %c0_i32_1 = arith.constant 0 : i32
    return %c0_i32, %c0_i32_0 : i32, i32
  }
  func.func @transform_4(%arg0: i32) -> (i32, i32) {
    %c0_i32 = arith.constant 0 : i32
    %c0_i32_0 = arith.constant 0 : i32
    %c0_i32_1 = arith.constant 0 : i32
    return %c0_i32, %c0_i32_0 : i32, i32
  }
  func.func @transform_5(%arg0: i32) -> (i32, i32) {
    %c0_i32 = arith.constant 0 : i32
    %c0_i32_0 = arith.constant 0 : i32
    %c0_i32_1 = arith.constant 0 : i32
    return %c0_i32, %c0_i32_0 : i32, i32
  }
  func.func @transform_6(%arg0: i32) -> (i32, i32) {
    %c0_i32 = arith.constant 0 : i32
    %c0_i32_0 = arith.constant 0 : i32
    %c0_i32_1 = arith.constant 0 : i32
    return %c0_i32, %c0_i32_0 : i32, i32
  }
  func.func @transform_7(%arg0: i32) -> (i32, i32) {
    %c0_i32 = arith.constant 0 : i32
    %c0_i32_0 = arith.constant 0 : i32
    %c0_i32_1 = arith.constant 0 : i32
    return %c0_i32, %c0_i32_0 : i32, i32
  }
  func.func @transform_8(%arg0: i32) -> i32 {
    %c0_i32 = arith.constant 0 : i32
    %c0_i32_0 = arith.constant 0 : i32
    return %c0_i32 : i32
  }
  func.func @transform_9(%arg0: i32) -> (i32, i32, i32) {
    %c0_i32 = arith.constant 0 : i32
    %c0_i32_0 = arith.constant 0 : i32
    %c0_i32_1 = arith.constant 0 : i32
    return %arg0, %c0_i32, %c0_i32_0 : i32, i32, i32
  }
  func.func @transform_10(%arg0: i32) -> (i32, i32, i32) {
    %c0_i32 = arith.constant 0 : i32
    %c0_i32_0 = arith.constant 0 : i32
    %c0_i32_1 = arith.constant 0 : i32
    return %arg0, %c0_i32, %c0_i32_0 : i32, i32, i32
  }
}

</mosaic_0001>

<bundles_post_ra>
// kernel: tpu_custom_call.1
= control target key start
LH: loop header
LB: loop body
LE: loop exit
PB: predicated region body
PF: predicated region fallthrough
CT: control target
= control target key end

     0   :  { %s4075_s0 = inlined_call_operand.hbm [shape: bf16[2,32,400], index: 0, kind: input, shape index: {}]   ;;  %s4076_s1 = inlined_call_operand.vmem [shape: f32[1,362], index: 1, kind: input, shape index: {}]   ;;  %s4077_s2 = inlined_call_operand.hbm [shape: bf16[64,288], index: 2, kind: input, shape index: {}]   ;;  %s4078_s3 = inlined_call_operand.vmem [shape: f32[64,1], index: 3, kind: input, shape index: {}]   ;;  %s4079_s4 = inlined_call_operand.vmem [shape: bf16[8,288], index: 4, kind: input, shape index: {}]   ;;  %s4080_s5 = inlined_call_operand.vmem [shape: f32[8,1], index: 5, kind: input, shape index: {}]   ;;  %s4081_s6 = inlined_call_operand.vmem [shape: bf16[8,288], index: 6, kind: input, shape index: {}]   ;;  %s4082_s7 = inlined_call_operand.vmem [shape: f32[8,1], index: 7, kind: input, shape index: {}]   ;;  %s4083_s8 = inlined_call_operand.<no memory space> [shape: f32[1], index: 8, kind: input, shape index: {}]   ;;  %s4084_s9 = inlined_call_operand.hbm [shape: f32[2,8,324], index: 9, kind: output, shape index: {0}]   ;;  %s4085_s10 = inlined_call_operand.hbm [shape: f32[2,8,324], index: 10, kind: output, shape index: {1}]  }
   0x1   :  { %16 = sst [smem:[#allocation4]] %s4083_s8 }
   0x2   :  { %17 = vsyncpa [#allocation6], 0 }
   0x3   :  { %19 = vsyncpa [#allocation6 + $0x1], 0 }
   0x4   :  { %20 = vsyncpa [#allocation9], 0 }
   0x5   :  { %21 = vsyncpa [#allocation7], 0 }
   0x6   :  { %23 = vsyncpa [#allocation7 + $0x1], 0 }
   0x7   :  { %24 = vsyncpa [#allocation12], 0 }
   0x8   :  { %26 = vsyncpa [#allocation12 + $0x1], 0  ;;  %s2933_s15 = smov 0   ;;  %s2935_s16 = smov 0  }
   0x9   :  { %s2937_s17 = smov 0   ;;  %s2939_s18 = smov 0  }
   0xa LB: > { %s2954_s8 = sadd.s32 4294967295, %s2854_s18   ;;  %s2357_s19 = sadd.s32 4294967294, %s2854_s18   ;;  %s2854_s18 = sphi %s2939_s18, %s4114_s18   ;;  %s2850_s17 = sphi %s2937_s17, %s4117_s17   ;;  %s2846_s16 = sphi %s2935_s16, %s4116_s16   ;;  %s2842_s15 = sphi %s2933_s15, %s4115_s15  }
   0xb   : > { %p52_p0 = scmp.ne.s32.totalorder %s2846_s16, %s2842_s15  ;;  %p4086_p1 = scmp.eq.s32.totalorder %s2954_s8, 0 }
   0xc   : > { %p250_p3 = scmp.eq.s32.totalorder %s2357_s19, 1  ;;  %p2358_p5 = scmp.ge.s32.totalorder %s2854_s18, 1 }
   0xd   : > { %p2963_p4 = por %p4086_p1, %p52_p0  ;;  %p283_p7 = scmp.lt.s32.totalorder %s2854_s18, 3 }
   0xe   : > { %p2968_p6 = por %p250_p3, %p52_p0  ;;  %s2856_s23 = smov [#allocation8]  }
   0xf   : > { %s4096_s20 = scalar_select %p2963_p4, 1, 0 }
  0x10   : > { %s4097_s21 = scalar_select %p2968_p6, 1, 0 }
  0x11   : > { %p2973_p8 = pnand %p2358_p5, %p283_p7  ;;  %s298_s24 = sshll.u32 %s2856_s23, 4  ;;  %s2977_s24 = int_to_ptr.vmem [resolvable:$true] %s298_s24 }
  0x12   : > { %4098 = sst [smem:[#allocation17_spill]] %s4097_s21  ;;  %s2989_s26 = sadd.s32 1, %s2854_s18  }
  0x13   : > { %s4099_s22 = scalar_select %p2973_p8, 1, 0 }
  0x14   : > { %p2591_p9 = pneg %p2973_p8  ;;  %4101 = sst [smem:[#allocation18_spill]] %s2989_s26 }
  0x15   : > { %s39_s27 = sadd.s32 1, %s2850_s17  ;;  %s36_s28 = ssub.s32 %s2854_s18, %s2989_s26 }
  0x16   : > { %p2984_p11 = pnand %p2591_p9, %p4086_p1  ;;  %s2694_s11 = scalar_lea.hbm %s4077_s2, 1536 }
  0x17   : > { %p2695_p12 = scmp.ne.s32.totalorder %s4077_s2, %s2694_s11  ;;  %p2701_p5 = scmp.lt.u32.totalorder %s2694_s11, %s4077_s2 }
  0x18   : > { %p2696_p13 = pneg %p2984_p11 }
  0x1a   : > { %p2697_p0 = pnand %p2696_p13, %p2695_p12 }
  0x1c   : > { %p2698_p3 = pneg %p2697_p0 }
  0x1e   : > { %p2703_p7 = pnand %p2701_p5, %p2698_p3 }
  0x20   : > { %2706 = shalt.err (!%p2703_p7)
}
  0x21   : > { %s2707_s23 = scalar_lea.vmem %s2977_s24, 1536  ;;  %p2715_p2 = scmp.lt.s32.totalorder %s2977_s24, %s2977_s24 }
  0x22   : > { %p2708_p9 = scmp.ne.s32.totalorder %s2977_s24, %s2707_s23  ;;  %p2716_p6 = scmp.lt.s32.totalorder %s2707_s23, %s2707_s23 }
  0x24   : > { %p2710_p10 = pnand %p2708_p9, %p2696_p13  ;;  %p2717_p4 = por %p2716_p6, %p2715_p2 }
  0x26   : > { %p2711_p1 = pneg %p2710_p10 }
  0x28   : > { %p2718_p8 = pnand %p2717_p4, %p2711_p1 }
  0x2a   : > { %2721 = shalt.err (!%p2718_p8)
}
  0x2b   : > { %s2857_s29 = smov 192   ;;  %s2858_s30 = smov 12  }
  0x2c   : > { %2594 = dma.hbm_to_vmem [thread:$0]  (!%p2984_p11), %s4077_s2, 1536, %s2977_s24, [#allocation9], %s2857_s29, %s2857_s29, %s2858_s30  }
  0x2d   : > { %p37_p2 = scmp.eq.s32.totalorder %s36_s28, 0  ;;  %p46_p1 = scmp.ne.s32.totalorder %s2850_s17, %s2846_s16 }
  0x2e   : > { %p47_p4 = scmp.eq.s32.totalorder %s2854_s18, 0  ;;  %p2607_p6 = scmp.lt.s32.totalorder %s2854_s18, 2 }
  0x2f   : > { %s3020_s13 = scalar_select %p37_p2, %s2850_s17, %s39_s27  }
  0x30   : > { %p48_p8 = por %p47_p4, %p46_p1  ;;  %p4102_p10 = scmp.eq.s32.totalorder %s2954_s8, 1 }
  0x31   : > { %s330_s19 = sand.u32 1, %s2850_s17   ;;  %s2409_s23 = sshll.u32 %s2854_s18, 10 }
  0x32   : > { %p3024_p12 = por %p4102_p10, %p46_p1  ;;  %s2361_s26 = sshll.u32 %s330_s19, 6 }
  0x33   : > { %s3033_s11 = scalar_lea.hbm %s4075_s0, %s2409_s23  ;;  %s334_s24 = scalar_lea.vmem [#allocation5], %s2361_s26 }
  0x34   : > { %s341_s27 = sshll.u32 %s334_s24, 4  ;;  %p3035_p11 = pnand %p2607_p6, %p48_p8  ;;  %s3039_s27 = int_to_ptr.vmem [resolvable:$true] %s341_s27 }
  0x35   : > { %s3041_s29 = scalar_lea.sflag [#allocation6], %s330_s19  ;;  %s2722_s30 = scalar_lea.hbm %s3033_s11, 1024 }
  0x36   : > { %p2723_p13 = scmp.ne.s32.totalorder %s3033_s11, %s2722_s30  ;;  %p2724_p0 = pneg %p3035_p11 }
  0x37   : > { %s2727_s12 = scalar_lea.hbm %s4075_s0, 2048  ;;  %p2728_p7 = scmp.lt.u32.totalorder %s3033_s11, %s4075_s0 }
  0x38   : > { %p2725_p3 = pnand %p2724_p0, %p2723_p13  ;;  %p2729_p9 = scmp.lt.u32.totalorder %s2727_s12, %s2722_s30 }
  0x39   : > { %p2731_p1 = scmp.lt.u32.totalorder %s2722_s30, %s3033_s11 }
  0x3a   : > { %p2726_p5 = pneg %p2725_p3  ;;  %p2730_p2 = por %p2729_p9, %p2728_p7 }
  0x3c   : > { %p2732_p4 = por %p2731_p1, %p2730_p2 }
  0x3e   : > { %p2733_p6 = pnand %p2732_p4, %p2726_p5 }
  0x40   : > { %2736 = shalt.err (!%p2733_p6)
}
  0x41   : > { %s2737_s19 = scalar_lea.vmem %s3039_s27, 1024  ;;  %s2859_s24 = smov [#allocation5]  }
  0x42   : > { %p2738_p8 = scmp.ne.s32.totalorder %s3039_s27, %s2737_s19  ;;  %s2742_s21 = sshll.u32 %s2859_s24, 4  ;;  %s2743_s21 = int_to_ptr.vmem [resolvable:$false] %s2742_s21 }
  0x43   : > { %s2744_s26 = scalar_lea.vmem %s2743_s21, 2048  ;;  %p2745_p3 = scmp.lt.s32.totalorder %s3039_s27, %s2743_s21 }
  0x44   : > { %p2740_p10 = pnand %p2738_p8, %p2724_p0  ;;  %p2746_p7 = scmp.lt.s32.totalorder %s2744_s26, %s2737_s19 }
  0x46   : > { %p2741_p13 = pneg %p2740_p10  ;;  %p2747_p9 = por %p2746_p7, %p2745_p3 }
  0x48   : > { %p2748_p2 = pnand %p2747_p9, %p2741_p13 }
  0x4a   : > { %2751 = shalt.err (!%p2748_p2)
}
  0x4b   : > { %s2860_s30 = smov 256   ;;  %s2861_s12 = smov 16  }
  0x4c   : > { %2598 = dma.hbm_to_vmem [thread:$0]  (!%p3035_p11), %s3033_s11, 1024, %s3039_s27, %s3041_s29, %s2860_s30, %s2860_s30, %s2861_s12  }
  0x4d   : > { %p4105_p0 = scmp.ne.s32.totalorder %s4099_s22, 0 }
  0x4e   : > { %s3072_s23 = sand.u32 (!%p4105_p0), 1, %s2846_s16   ;;  %p4106_p5 = scmp.ne.s32.totalorder (!%p4105_p0), %s4096_s20, 0 }
  0x4f   : > { %353 = sbr.rel (%p4105_p0) target bundleno = 1085 (0x43d), region = 56  ;;  %s2365_s25 = sshll.u32 (!%p4105_p0), %s3072_s23, 6 }
  0x50   : > { %s356_s19 = scalar_lea.sflag (!%p4105_p0), [#allocation6], %s3072_s23  ;;  %s3076_s24 = scalar_lea.vmem (!%p4105_p0), [#allocation5], %s2365_s25 }
  0x56   : > { %2825 = dma.done.wait (%p4106_p5), %s356_s19, 1024  }
  0x57   : > { %2827 = vsyncadd (%p4106_p5), %s356_s19, 4294966272  ;;  %p4107_p11 = scmp.eq.s32.totalorder %s2954_s8, 0 }
  0x59   : > { %2829 = dma.done.wait (%p4107_p11), [#allocation9], 1536   ;;  %p4108_p1 = pmov %p4107_p11 }
  0x5a   : > { %v3087_v0 = vld [vmem:[%s3076_s24 + $0x4] ss:$16 sps:$4 sm:$0xff]   ;;  %v3090_v1 = vld [vmem:[%s3076_s24] ss:$16 sps:$4 sm:$0xff]   ;;  %vm448_vm0 = vcmask 867328   ;;  %s4092_s22 = smov 90  }
  0x5b   : > { %2831 = vsyncadd (%p4108_p1), [#allocation9], 4294965760  ;;  %676 = vrot.lane.b32.xlu0 %v3087_v0, %s4092_s22  ;;  %v2663_v2 = vld [vmem:[%s3076_s24 + $0x8] ss:$16 sps:$4 sm:$0xff]   ;;  %900 = vmatprep.subr.bf16.mxu0 %v3087_v0  ;;  %v3099_v3 = vld [vmem:[%s3076_s24 + $0x24] ss:$16 sps:$4 sm:$0xff]  }
  0x5c   : > { %674 = vrot.lane.b32.xlu1 %v3090_v1, %s4092_s22  ;;  %901 = vmatpush1.bf16.msra.mxu0 %v3090_v1  ;;  %v2667_v4 = vld [vmem:[%s3076_s24 + $0x28] ss:$16 sps:$4 sm:$0xff]   ;;  %v3104_v5 = vld [vmem:[%s3076_s24 + $0x20] ss:$16 sps:$4 sm:$0xff]   ;;  %449 = vst.msk [vmem:[#allocation2 + $0x10] sm:$0xff] %vm448_vm0, %v2663_v2  ;;  %v2863_v6 = vmov 0  }
  0x5d   : > { %902 = vmatprep.subr.bf16.mxu0 %v3099_v3  ;;  %452 = vst.msk [vmem:[#allocation2 + $0x28] sm:$0xff] %vm448_vm0, %v2667_v4  ;;  %1005 = vmatprep.mubr.bf16.mxu1 %v2863_v6  ;;  %s2864_s20 = smov 109   ;;  %s4094_s11 = smov 108   ;;  %v2670_v7 = vld [vmem:[%s3076_s24 + $0xc] ss:$16 sps:$4 sm:$0xff]   ;;  %vm690_vm1 = vcmask 736256  }
  0x5e   : > { %2658 = vset.pattern.permute.xlu0 %v2863_v6  ;;  %2659 = vset.pattern.permute.xlu1 %v2863_v6  ;;  %s2866_s27 = smov 127   ;;  %s2867_s28 = smov 92   ;;  %v2671_v8 = vld [vmem:[%s3076_s24 + $0x2c] ss:$16 sps:$4 sm:$0xff]   ;;  %v3159_v9 = vld [vmem:[#allocation8 + $0x4] ss:$12 sps:$4 sm:$0xff]  }
  0x5f   : > { %678 = vrot.lane.b32.xlu0 %v2663_v2, %s4092_s22  ;;  %s2868_s29 = smov 126   ;;  %s2869_s21 = smov 91   ;;  %932 = vmatprep.mubr.bf16.mxu0 %v3159_v9  ;;  %v779_v16 = vld [vmem:[%s4078_s3] sm:$0xff]  ;;  %v780_v17 = vld [vmem:[%s4078_s3 + $0x8] sm:$0xff]  ;;  %v782_v19 = vld [vmem:[%s4078_s3 + $0x18] sm:$0xff]  ;;  %vm887_vm2 = vcmask 261120  }
  0x60   : > { %684 = vrot.lane.b32.xlu1 %v3099_v3, %s4092_s22  ;;  %903 = vmatpush1.bf16.msra.mxu0 %v3104_v5  ;;  %s2870_s26 = smov 110   ;;  %v781_v22 = vld [vmem:[%s4078_s3 + $0x10] sm:$0xff]  ;;  %v784_v26 = vld [vmem:[%s4078_s3 + $0x28] sm:$0xff]  ;;  %v783_v28 = vld [vmem:[%s4078_s3 + $0x20] sm:$0xff]  ;;  %vm465_vm3 = vcmask 1039360   ;;  %vm620_vm4 = vcmask 752640  }
  0x61   : > { %v3222_v24 = vld [vmem:[#allocation8 + $0x8] ss:$12 sps:$4 sm:$0xff]   ;;  %v786_v30 = vld [vmem:[%s4078_s3 + $0x38] sm:$0xff]  ;;  %v3252_v36 = vld [vmem:[#allocation8 + $0x20] ss:$12 sps:$4 sm:$0xff]   ;;  %vm494_vm5 = vcmask 1031168  }
  0x62   : > { %v785_v32 = vld [vmem:[%s4078_s3 + $0x30] sm:$0xff]  ;;  %v3264_v46 = vld [vmem:[#allocation8 + $0x38] ss:$12 sps:$4 sm:$0xff]   ;;  %vm655_vm6 = vcmask 744448   ;;  %vm523_vm7 = vcmask 900096   ;;  %vm552_vm8 = vcmask 891904  }
  0x63   : > { %686 = vrot.lane.b32.xlu0 %v2667_v4, %s4092_s22  ;;  %v727_v33 = vld [vmem:[#allocation2 + $0x10] sm:$0xff]  ;;  %vm581_vm9 = vcmask 883712   ;;  %vm1255_vm10 = vcmask 556032   ;;  %s4109_s25 = smov 108   ;;  %s4110_s19 = smov 90   ;;  %vm2872_vm11 = vmmov 0  }
  0x64   : > { %682 = vrot.lane.b32.xlu1 %v3104_v5, %s4092_s22  ;;  %v730_v41 = vld [vmem:[#allocation2 + $0x28] sm:$0xff]  ;;  %v3276_v57 = vld [vmem:[#allocation8 + $0x50] ss:$12 sps:$4 sm:$0xff]   ;;  %s2579_s30 = smul.u32 384, %s2954_s8 }
  0x67   : > { %544 = vrot.lane.b32.xlu0 %v2663_v2, %s2864_s20 }
  0x68   : > { %550 = vrot.lane.b32.xlu1 %v2667_v4, %s2864_s20 }
  0x6b   : > { %573 = vrot.lane.b32.xlu0 %v2663_v2, %s4094_s11 }
  0x6c   : > { %457 = vrot.lane.b32.xlu1 %v2663_v2, %s2866_s27 }
  0x6f   : > { %455 = vrot.lane.b32.xlu0 %v3087_v0, %s2866_s27 }
  0x70   : > { %453 = vrot.lane.b32.xlu1 %v3090_v1, %s2866_s27 }
  0x73   : > { %579 = vrot.lane.b32.xlu0 %v2667_v4, %s4094_s11 }
  0x74   : > { %463 = vrot.lane.b32.xlu1 %v2667_v4, %s2866_s27 }
  0x77   : > { %461 = vrot.lane.b32.xlu0 %v3099_v3, %s2866_s27 }
  0x78   : > { %459 = vrot.lane.b32.xlu1 %v3104_v5, %s2866_s27 }
  0x7b   : > { %608 = vrot.lane.b32.xlu0 %v2663_v2, %s2867_s28 }
  0x7c   : > { %610 = vrot.lane.b32.xlu1 %v2670_v7, %s2867_s28 }
  0x7f   : > { %486 = vrot.lane.b32.xlu0 %v2663_v2, %s2868_s29 }
  0x80   : > { %484 = vrot.lane.b32.xlu1 %v3087_v0, %s2868_s29 }
  0x83   : > { %482 = vrot.lane.b32.xlu0 %v3090_v1, %s2868_s29 }
  0x84   : > { %616 = vrot.lane.b32.xlu1 %v2667_v4, %s2867_s28 }
  0x87   : > { %618 = vrot.lane.b32.xlu0 %v2671_v8, %s2867_s28 }
  0x88   : > { %492 = vrot.lane.b32.xlu1 %v2667_v4, %s2868_s29 }
  0x8b   : > { %490 = vrot.lane.b32.xlu0 %v3099_v3, %s2868_s29 }
  0x8c   : > { %488 = vrot.lane.b32.xlu1 %v3104_v5, %s2868_s29 }
  0x8f   : > { %643 = vrot.lane.b32.xlu0 %v2663_v2, %s2869_s21 }
  0x90   : > { %645 = vrot.lane.b32.xlu1 %v2670_v7, %s2869_s21 }
  0x93   : > { %515 = vrot.lane.b32.xlu0 %v2663_v2, %s2870_s26 }
  0x94   : > { %513 = vrot.lane.b32.xlu1 %v3087_v0, %s2870_s26 }
  0x97   : > { %511 = vrot.lane.b32.xlu0 %v3090_v1, %s2870_s26 }
  0x98   : > { %651 = vrot.lane.b32.xlu1 %v2667_v4, %s2869_s21 }
  0x9b   : > { %653 = vrot.lane.b32.xlu0 %v2671_v8, %s2869_s21 }
  0x9c   : > { %521 = vrot.lane.b32.xlu1 %v2667_v4, %s2870_s26 }
  0x9f   : > { %519 = vrot.lane.b32.xlu0 %v3099_v3, %s2870_s26 }
  0xa0   : > { %517 = vrot.lane.b32.xlu1 %v3104_v5, %s2870_s26 }
  0xa3   : > { %542 = vrot.lane.b32.xlu0 %v3087_v0, %s2864_s20 }
  0xa4   : > { %540 = vrot.lane.b32.xlu1 %v3090_v1, %s2864_s20 }
  0xa7   : > { %548 = vrot.lane.b32.xlu0 %v3099_v3, %s2864_s20 }
  0xa8   : > { %546 = vrot.lane.b32.xlu1 %v3104_v5, %s2864_s20 }
  0xab   : > { %571 = vrot.lane.b32.xlu0 %v3087_v0, %s4094_s11 }
  0xac   : > { %569 = vrot.lane.b32.xlu1 %v3090_v1, %s4094_s11 }
  0xaf   : > { %577 = vrot.lane.b32.xlu0 %v3099_v3, %s4094_s11 }
  0xb0   : > { %575 = vrot.lane.b32.xlu1 %v3104_v5, %s4094_s11 }
  0xb3   : > { %606 = vrot.lane.b32.xlu0 %v3087_v0, %s2867_s28 }
  0xb4   : > { %604 = vrot.lane.b32.xlu1 %v3090_v1, %s2867_s28 }
  0xb7   : > { %614 = vrot.lane.b32.xlu0 %v3099_v3, %s2867_s28 }
  0xb8   : > { %612 = vrot.lane.b32.xlu1 %v3104_v5, %s2867_s28 }
  0xbb   : > { %680 = vrot.lane.b32.xlu0 %v2670_v7, %s4092_s22 }
  0xbc   : > { %641 = vrot.lane.b32.xlu1 %v3087_v0, %s2869_s21 }
  0xbf   : > { %639 = vrot.lane.b32.xlu0 %v3090_v1, %s2869_s21 }
  0xc0   : > { %688 = vrot.lane.b32.xlu1 %v2671_v8, %s4092_s22  ;;  %s2873_s22 = smov [#allocation10]  }
  0xc1   : > { %s2756_s12 = sshll.u32 %s2873_s22, 4  ;;  %s2757_s12 = int_to_ptr.vmem [resolvable:$false] %s2756_s12 }
  0xc2   : > { %s2758_s11 = scalar_lea.vmem %s2757_s12, 768 }
  0xc3   : > { %649 = vrot.lane.b32.xlu0 %v3099_v3, %s2869_s21 }
  0xc4   : > { %647 = vrot.lane.b32.xlu1 %v3104_v5, %s2869_s21 }
  0xc7   : > { %789 = vperm.xlu0 %2658, %v779_v16  }
  0xc8   : > { %794 = vperm.xlu1 %2659, %v780_v17  }
  0xcb   : > { %804 = vperm.xlu0 %2658, %v782_v19  }
  0xcc   : > { %799 = vperm.xlu1 %2659, %v781_v22  }
  0xcd   : > { %v677_v10 = vpop.permute.xlu0 %676 }
  0xce   : > { %v675_v11 = vpop.permute.xlu1 %674 }
  0xcf   : > { %v691_v12 = vsel %vm690_vm1, %v675_v11, %v677_v10  ;;  %814 = vperm.xlu0 %2658, %v784_v26  }
  0xd0   : > { %809 = vperm.xlu1 %2659, %v783_v28  }
  0xd1   : > { %v3201_v13 = vpop.permute.xlu0 %678 }
  0xd2   : > { %v692_v14 = vsel %vm690_vm1, %v677_v10, %v3201_v13  ;;  %v685_v15 = vpop.permute.xlu1 %684 }
  0xd3   : > { %973 = vmatprep.subr.bf16.mxu1 %v692_v14  ;;  %824 = vperm.xlu0 %2658, %v786_v30  }
  0xd4   : > { %974 = vmatpush1.bf16.msra.mxu1 %v691_v12  ;;  %819 = vperm.xlu1 %2659, %v785_v32  }
  0xd5   : > { %v3211_v18 = vpop.permute.xlu0 %686 }
  0xd6   : > { %v695_v20 = vsel %vm690_vm1, %v685_v15, %v3211_v18  ;;  %v683_v21 = vpop.permute.xlu1 %682 }
  0xd7   : > { %v694_v23 = vsel %vm690_vm1, %v683_v21, %v685_v15  ;;  %975 = vmatprep.subr.bf16.mxu1 %v695_v20 }
  0xd8   : > { %976 = vmatpush1.bf16.msra.mxu1 %v694_v23 }
  0xd9   : > { %v3224_v25 = vpop.permute.xlu0 %544 }
  0xda   : > { %565 = vst.msk [vmem:[#allocation2 + $0xd0] sm:$0xff] %vm448_vm0, %v3224_v25  ;;  %v3231_v27 = vpop.permute.xlu1 %550 }
  0xdb   : > { %568 = vst.msk [vmem:[#allocation2 + $0xe8] sm:$0xff] %vm448_vm0, %v3231_v27  ;;  %2387 = vmatmul.mubr.msk.bf16.vlgmr.msra.gmra.mrb[0].mxu1 %vm887_vm2, %v3222_v24 }
  0xdc   : > { %1015 = vmatprep.mubr.bf16.mxu1 %v2863_v6 }
  0xdd   : > { %v3241_v29 = vpop.permute.xlu0 %573 }
  0xde   : > { %594 = vst.msk [vmem:[#allocation2 + $0x100] sm:$0xff] %vm448_vm0, %v3241_v29  ;;  %v458_v31 = vpop.permute.xlu1 %457 }
  0xdf   : > { %478 = vst.msk [vmem:[#allocation2 + $0x40] sm:$0xff] %vm448_vm0, %v458_v31 }
  0xe1   : > { %v456_v34 = vpop.permute.xlu0 %455  ;;  %v751_v35 = vld [vmem:[#allocation2 + $0xd0] sm:$0xff] }
  0xe2   : > { %v467_v37 = vsel %vm465_vm3, %v456_v34, %v458_v31  ;;  %v454_v38 = vpop.permute.xlu1 %453  ;;  %2410 = vmatprep.subr.bf16.mxu1 %v751_v35  ;;  %v754_v39 = vld [vmem:[#allocation2 + $0xe8] sm:$0xff] }
  0xe3   : > { %v466_v40 = vsel %vm465_vm3, %v454_v38, %v456_v34  ;;  %2411 = vmatpush3.bf16.msra.mxu1 %v727_v33  ;;  %904 = vmatprep.subr.bf16.mxu0 %v467_v37 }
  0xe4   : > { %2412 = vmatprep.subr.bf16.mxu1 %v754_v39  ;;  %905 = vmatpush1.bf16.msra.mxu0 %v466_v40 }
  0xe5   : > { %v3256_v42 = vpop.permute.xlu0 %579  ;;  %2388 = vmatmul.mubr.msk.bf16.gmra.mrb[4].mxu1 %vm887_vm2, %v3252_v36  ;;  %v757_v44 = vld [vmem:[#allocation2 + $0x100] sm:$0xff] }
  0xe6   : > { %597 = vst.msk [vmem:[#allocation2 + $0x118] sm:$0xff] %vm448_vm0, %v3256_v42  ;;  %v464_v43 = vpop.permute.xlu1 %463  ;;  %1025 = vmatprep.mubr.bf16.mxu1 %v2863_v6  ;;  %v733_v49 = vld [vmem:[#allocation2 + $0x40] sm:$0xff] }
  0xe7   : > { %481 = vst.msk [vmem:[#allocation2 + $0x58] sm:$0xff] %vm448_vm0, %v464_v43  ;;  %2413 = vmatpush3.bf16.msra.mxu1 %v730_v41 }
  0xe8   : > { %2414 = vmatprep.subr.bf16.mxu1 %v757_v44  ;;  %v3313_v44 = vld [vmem:[#allocation8 + $0x1c] ss:$12 sps:$4 sm:$0xff]  }
  0xe9   : > { %v462_v45 = vpop.permute.xlu0 %461 }
  0xea   : > { %v469_v47 = vsel %vm465_vm3, %v462_v45, %v464_v43  ;;  %v460_v48 = vpop.permute.xlu1 %459  ;;  %v3311_v43 = vld [vmem:[#allocation8] ss:$12 sps:$4 sm:$0xff]  }
  0xeb   : > { %v468_v50 = vsel %vm465_vm3, %v460_v48, %v462_v45  ;;  %2415 = vmatpush3.bf16.msra.mxu1 %v733_v49  ;;  %906 = vmatprep.subr.bf16.mxu0 %v469_v47 }
  0xec   : > { %907 = vmatpush1.bf16.msra.mxu0 %v468_v50 }
  0xed   : > { %v3268_v51 = vpop.permute.xlu0 %608  ;;  %v760_v52 = vld [vmem:[#allocation2 + $0x118] sm:$0xff]  ;;  %2389 = vmatmul.mubr.msk.bf16.gmra.mrb[8].mxu1 %vm887_vm2, %v3264_v46 }
  0xee   : > { %v611_v53 = vpop.permute.xlu1 %610  ;;  %2416 = vmatprep.subr.bf16.mxu1 %v760_v52  ;;  %v736_v54 = vld [vmem:[#allocation2 + $0x58] sm:$0xff]  ;;  %1035 = vmatprep.mubr.bf16.mxu1 %v2863_v6 }
  0xef   : > { %v623_v55 = vsel %vm620_vm4, %v3268_v51, %v611_v53  ;;  %2417 = vmatpush3.bf16.msra.mxu1 %v736_v54  ;;  %v2681_v54 = vld [vmem:[#allocation8 + $0x18] ss:$12 sps:$4 sm:$0xff]  }
  0xf0   : > { %635 = vst.msk [vmem:[#allocation2 + $0x130] sm:$0xff] %vm448_vm0, %v623_v55 }
  0xf1   : > { %v487_v56 = vpop.permute.xlu0 %486 }
  0xf2   : > { %507 = vst.msk [vmem:[#allocation2 + $0x70] sm:$0xff] %vm448_vm0, %v487_v56  ;;  %v485_v58 = vpop.permute.xlu1 %484 }
  0xf3   : > { %v496_v59 = vsel %vm494_vm5, %v485_v58, %v487_v56 }
  0xf4   : > { %908 = vmatprep.subr.bf16.mxu0 %v496_v59 }
  0xf5   : > { %v483_v60 = vpop.permute.xlu0 %482  ;;  %2390 = vmatmul.mubr.msk.bf16.gmra.mrb[12].mxu1 %vm887_vm2, %v3276_v57 }
  0xf6   : > { %v495_v61 = vsel %vm494_vm5, %v483_v60, %v485_v58  ;;  %v3283_v62 = vpop.permute.xlu1 %616  ;;  %1078 = vmatprep.mubr.bf16.mxu1 %v3159_v9 }
  0xf7   : > { %v763_v63 = vld [vmem:[#allocation2 + $0x130] sm:$0xff]  ;;  %909 = vmatpush1.bf16.msra.mxu0 %v495_v61 }
  0xf8   : > { %2418 = vmatprep.subr.bf16.mxu1 %v763_v63 }
  0xf9   : > { %v619_v0 = vpop.permute.xlu0 %618  ;;  %v739_v1 = vld [vmem:[#allocation2 + $0x70] sm:$0xff] }
  0xfa   : > { %v626_v2 = vsel %vm620_vm4, %v3283_v62, %v619_v0  ;;  %v493_v3 = vpop.permute.xlu1 %492  ;;  %2419 = vmatpush3.bf16.msra.mxu1 %v739_v1  ;;  %v2684_v0 = vld [vmem:[#allocation8 + $0x30] ss:$12 sps:$4 sm:$0xff]   ;;  %v2685_v1 = vld [vmem:[#allocation8 + $0x4c] ss:$12 sps:$4 sm:$0xff]  }
  0xfb   : > { %638 = vst.msk [vmem:[#allocation2 + $0x148] sm:$0xff] %vm448_vm0, %v626_v2  ;;  %510 = vst.msk [vmem:[#allocation2 + $0x88] sm:$0xff] %vm448_vm0, %v493_v3 }
  0xfd   : > { %v491_v4 = vpop.permute.xlu0 %490 }
  0xfe   : > { %v498_v5 = vsel %vm494_vm5, %v491_v4, %v493_v3  ;;  %v489_v7 = vpop.permute.xlu1 %488 }
  0xff   : > { %v497_v8 = vsel %vm494_vm5, %v489_v7, %v491_v4  ;;  %910 = vmatprep.subr.bf16.mxu0 %v498_v5 }
 0x100   : > { %911 = vmatpush1.bf16.msra.mxu0 %v497_v8 }
 0x101   : > { %v3292_v9 = vpop.permute.xlu0 %643 }
 0x102   : > { %v646_v10 = vpop.permute.xlu1 %645  ;;  %v766_v11 = vld [vmem:[#allocation2 + $0x148] sm:$0xff] }
 0x103   : > { %v742_v12 = vld [vmem:[#allocation2 + $0x88] sm:$0xff]  ;;  %v658_v14 = vsel %vm655_vm6, %v3292_v9, %v646_v10  ;;  %2420 = vmatprep.subr.bf16.mxu1 %v766_v11 }
 0x104   : > { %670 = vst.msk [vmem:[#allocation2 + $0x160] sm:$0xff] %vm448_vm0, %v658_v14  ;;  %2421 = vmatpush3.bf16.msra.mxu1 %v742_v12  ;;  %v2687_v10 = vld [vmem:[#allocation8 + $0x48] ss:$12 sps:$4 sm:$0xff]  }
 0x105   : > { %v516_v15 = vpop.permute.xlu0 %515 }
 0x106   : > { %536 = vst.msk [vmem:[#allocation2 + $0xa0] sm:$0xff] %vm448_vm0, %v516_v15  ;;  %v514_v16 = vpop.permute.xlu1 %513 }
 0x107   : > { %v525_v17 = vsel %vm523_vm7, %v514_v16, %v516_v15 }
 0x108   : > { %912 = vmatprep.subr.bf16.mxu0 %v525_v17 }
 0x109   : > { %v512_v19 = vpop.permute.xlu0 %511 }
 0x10a   : > { %v524_v20 = vsel %vm523_vm7, %v512_v19, %v514_v16  ;;  %v3300_v21 = vpop.permute.xlu1 %651 }
 0x10b   : > { %v769_v22 = vld [vmem:[#allocation2 + $0x160] sm:$0xff]  ;;  %913 = vmatpush1.bf16.msra.mxu0 %v524_v20 }
 0x10c   : > { %2422 = vmatprep.subr.bf16.mxu1 %v769_v22 }
 0x10d   : > { %v654_v23 = vpop.permute.xlu0 %653  ;;  %v745_v26 = vld [vmem:[#allocation2 + $0xa0] sm:$0xff] }
 0x10e   : > { %v661_v28 = vsel %vm655_vm6, %v3300_v21, %v654_v23  ;;  %v522_v30 = vpop.permute.xlu1 %521  ;;  %2423 = vmatpush3.bf16.msra.mxu1 %v745_v26 }
 0x10f   : > { %673 = vst.msk [vmem:[#allocation2 + $0x178] sm:$0xff] %vm448_vm0, %v661_v28  ;;  %539 = vst.msk [vmem:[#allocation2 + $0xb8] sm:$0xff] %vm448_vm0, %v522_v30 }
 0x111   : > { %v520_v31 = vpop.permute.xlu0 %519 }
 0x112   : > { %v527_v32 = vsel %vm523_vm7, %v520_v31, %v522_v30  ;;  %v518_v33 = vpop.permute.xlu1 %517 }
 0x113   : > { %v526_v34 = vsel %vm523_vm7, %v518_v33, %v520_v31  ;;  %914 = vmatprep.subr.bf16.mxu0 %v527_v32 }
 0x114   : > { %915 = vmatpush1.bf16.msra.mxu0 %v526_v34 }
 0x115   : > { %v543_v35 = vpop.permute.xlu0 %542 }
 0x116   : > { %v554_v37 = vsel %vm552_vm8, %v543_v35, %v3224_v25  ;;  %v541_v38 = vpop.permute.xlu1 %540  ;;  %v772_v39 = vld [vmem:[#allocation2 + $0x178] sm:$0xff] }
 0x117   : > { %v748_v40 = vld [vmem:[#allocation2 + $0xb8] sm:$0xff]  ;;  %v553_v41 = vsel %vm552_vm8, %v541_v38, %v543_v35  ;;  %2424 = vmatprep.subr.bf16.mxu1 %v772_v39  ;;  %916 = vmatprep.subr.bf16.mxu0 %v554_v37 }
 0x118   : > { %2425 = vmatpush3.bf16.msra.mxu1 %v748_v40  ;;  %917 = vmatpush1.bf16.msra.mxu0 %v553_v41 }
 0x119   : > { %v549_v45 = vpop.permute.xlu0 %548 }
 0x11a   : > { %v556_v47 = vsel %vm552_vm8, %v549_v45, %v3231_v27  ;;  %v547_v48 = vpop.permute.xlu1 %546  ;;  %v2682_v27 = vld [vmem:[#allocation8 + $0x34] ss:$12 sps:$4 sm:$0xff]  }
 0x11b   : > { %v555_v25 = vsel %vm552_vm8, %v547_v48, %v549_v45  ;;  %1079 = vmatmul.mubr.bf16.vlgmr.msra.gmra.mrb[16].mxu1 %v3311_v43  ;;  %918 = vmatprep.subr.bf16.mxu0 %v556_v47 }
 0x11c   : > { %919 = vmatpush1.bf16.msra.mxu0 %v555_v25  ;;  %1086 = vmatprep.mubr.bf16.mxu1 %v3313_v44 }
 0x11d   : > { %v572_v49 = vpop.permute.xlu0 %571 }
 0x11e   : > { %v583_v50 = vsel %vm581_vm9, %v572_v49, %v3241_v29  ;;  %v570_v52 = vpop.permute.xlu1 %569 }
 0x11f   : > { %v582_v53 = vsel %vm581_vm9, %v570_v52, %v572_v49  ;;  %920 = vmatprep.subr.bf16.mxu0 %v583_v50 }
 0x120   : > { %921 = vmatpush1.bf16.msra.mxu0 %v582_v53 }
 0x121   : > { %v578_v55 = vpop.permute.xlu0 %577 }
 0x122   : > { %v585_v56 = vsel %vm581_vm9, %v578_v55, %v3256_v42  ;;  %v576_v58 = vpop.permute.xlu1 %575 }
 0x123   : > { %v584_v59 = vsel %vm581_vm9, %v576_v58, %v578_v55  ;;  %1087 = vmatmul.mubr.bf16.gmra.mrb[20].mxu1 %v2681_v54  ;;  %922 = vmatprep.subr.bf16.mxu0 %v585_v56  ;;  %v1202_v58 = vlaneseq }
 0x124   : > { %923 = vmatpush1.bf16.msra.mxu0 %v584_v59  ;;  %1094 = vmatprep.mubr.bf16.mxu1 %v2682_v27 }
 0x125   : > { %v607_v60 = vpop.permute.xlu0 %606 }
 0x126   : > { %v622_v29 = vsel %vm620_vm4, %v607_v60, %v3268_v51  ;;  %v605_v61 = vpop.permute.xlu1 %604 }
 0x127   : > { %v621_v63 = vsel %vm620_vm4, %v605_v61, %v607_v60  ;;  %924 = vmatprep.subr.bf16.mxu0 %v622_v29 }
 0x128   : > { %925 = vmatpush1.bf16.msra.mxu0 %v621_v63 }
 0x129   : > { %v615_v2 = vpop.permute.xlu0 %614 }
 0x12a   : > { %v625_v42 = vsel %vm620_vm4, %v615_v2, %v3283_v62  ;;  %v613_v3 = vpop.permute.xlu1 %612 }
 0x12b   : > { %v624_v4 = vsel %vm620_vm4, %v613_v3, %v615_v2  ;;  %1095 = vmatmul.mubr.bf16.gmra.mrb[24].mxu1 %v2684_v0  ;;  %926 = vmatprep.subr.bf16.mxu0 %v625_v42 }
 0x12c   : > { %927 = vmatpush1.bf16.msra.mxu0 %v624_v4  ;;  %1102 = vmatprep.mubr.bf16.mxu1 %v2685_v1 }
 0x12d   : > { %v681_v5 = vpop.permute.xlu0 %680 }
 0x12e   : > { %v693_v51 = vsel %vm690_vm1, %v3201_v13, %v681_v5  ;;  %v642_v7 = vpop.permute.xlu1 %641 }
 0x12f   : > { %705 = vst.msk [vmem:[#allocation2 + $0x190] sm:$0xff] %vm448_vm0, %v693_v51  ;;  %v657_v8 = vsel %vm655_vm6, %v642_v7, %v3292_v9  ;;  %v1200_v51 = vld [vmem:[%s4076_s1] sm:$0x7] }
 0x130   : > { %928 = vmatprep.subr.bf16.mxu0 %v657_v8 }
 0x131   : > { %v640_v62 = vpop.permute.xlu0 %639 }
 0x132   : > { %v656_v11 = vsel %vm655_vm6, %v640_v62, %v642_v7  ;;  %v689_v12 = vpop.permute.xlu1 %688 }
 0x133   : > { %v696_v14 = vsel %vm690_vm1, %v3211_v18, %v689_v12  ;;  %1103 = vmatmul.mubr.bf16.gmra.mrb[28].mxu1 %v2687_v10  ;;  %929 = vmatpush1.bf16.msra.mxu0 %v656_v11 }
 0x134   : > { %708 = vst.msk [vmem:[#allocation2 + $0x1a8] sm:$0xff] %vm448_vm0, %v696_v14  ;;  %2510 = vmatprep.mubr.msk.bf16.mxu1 %vm887_vm2, %v3222_v24 }
 0x135   : > { %v650_v13 = vpop.permute.xlu0 %649 }
 0x136   : > { %v660_v9 = vsel %vm655_vm6, %v650_v13, %v3300_v21  ;;  %v648_v15 = vpop.permute.xlu1 %647  ;;  %v775_v16 = vld [vmem:[#allocation2 + $0x190] sm:$0xff] }
 0x137   : > { %v659_v17 = vsel %vm655_vm6, %v648_v15, %v650_v13  ;;  %2506 = vmatprep.subr.bf16.mxu1 %v775_v16  ;;  %930 = vmatprep.subr.bf16.mxu0 %v660_v9 }
 0x138   : > { %2507 = vmatpush3.bf16.msra.mxu1 %v775_v16  ;;  %931 = vmatpush1.bf16.msra.mxu0 %v659_v17 }
 0x13b   : > { %v778_v18 = vld [vmem:[#allocation2 + $0x1a8] sm:$0xff]  ;;  %933 = vmatmul.mubr.bf16.vlgmr.msra.gmra.mrb[0].mxu0 %v3311_v43 }
 0x13c   : > { %2508 = vmatprep.subr.bf16.mxu1 %v778_v18  ;;  %942 = vmatprep.mubr.bf16.mxu0 %v3313_v44 }
 0x13d   : > { %2509 = vmatpush3.bf16.msra.mxu1 %v778_v18 }
 0x140   : > { %2511 = vmatmul.mubr.msk.bf16.vlgmr.msra.gmra.mrb[32].mxu1 %vm887_vm2, %v3252_v36 }
 0x141   : > { %2514 = vmatprep.mubr.msk.bf16.mxu1 %vm887_vm2, %v3264_v46 }
 0x143   : > { %943 = vmatmul.mubr.bf16.gmra.mrb[4].mxu0 %v2681_v54 }
 0x144   : > { %952 = vmatprep.mubr.bf16.mxu0 %v2682_v27 }
 0x146   : > { %v790_v52 = vpop.permute.xlu0 %789 }
 0x147   : > { %v795_v27 = vpop.permute.xlu1 %794 }
 0x148   : > { %2515 = vmatmul.mubr.msk.bf16.gmra.mrb[36].mxu1 %vm887_vm2, %v3276_v57 }
 0x14a   : > { %v3384_v59 = vpop.permute.xlu0 %804 }
 0x14b   : > { %953 = vmatmul.mubr.bf16.gmra.mrb[8].mxu0 %v2684_v0  ;;  %v800_v29 = vpop.permute.xlu1 %799 }
 0x14c   : > { %962 = vmatprep.mubr.bf16.mxu0 %v2685_v1  ;;  %v1203_v1 = vshrl.u32 %v1202_v58, 7 }
 0x14e   : > { %v3386_v3 = vpop.permute.xlu0 %814  ;;  %v1204_v5 = vsub.s32 0, %v1203_v1  ;;  %v1208_v7 = vsub.s32 1, %v1203_v1  ;;  %v1212_v8 = vsub.s32 2, %v1203_v1 }
 0x14f   : > { %v3388_v4 = vpop.permute.xlu1 %809 }
 0x150   : > { %v3393_v14 = vrot.slane %v1200_v51, %v1204_v5  ;;  %v3395_v17 = vrot.slane %v1200_v51, %v1208_v7 }
 0x153   : > { %963 = vmatmul.mubr.bf16.gmra.mrb[12].mxu0 %v2687_v10 }
 0x1ae   : > { %v1007_v24 = vpop.f32.mrb[0].mxu1 }
 0x1af   : > { %v3354_v19 = vpop.f32.mrb[1].mxu1 }
 0x1b0   : > { %v3356_v20 = vpop.f32.mrb[2].mxu1 }
 0x1b1   : > { %v3358_v21 = vpop.f32.mrb[3].mxu1 }
 0x1b8   : > { %v3360_v22 = vpop.f32.mrb[4].mxu1 }
 0x1b9   : > { %v3362_v36 = vpop.f32.mrb[5].mxu1 }
 0x1ba   : > { %v3364_v46 = vpop.f32.mrb[6].mxu1 }
 0x1bb   : > { %v3366_v23 = vpop.f32.mrb[7].mxu1 }
 0x1c0   : > { %v3368_v26 = vpop.f32.mrb[8].mxu1 }
 0x1c1   : > { %v3370_v57 = vpop.f32.mrb[9].mxu1 }
 0x1c2   : > { %v3372_v28 = vpop.f32.mrb[10].mxu1 }
 0x1c3   : > { %v3374_v30 = vpop.f32.mrb[11].mxu1 }
 0x1c8   : > { %v3376_v31 = vpop.f32.mrb[12].mxu1 }
 0x1c9   : > { %v3378_v32 = vpop.f32.mrb[13].mxu1 }
 0x1ca   : > { %v3380_v33 = vpop.f32.mrb[14].mxu1 }
 0x1cb   : > { %v3382_v34 = vpop.f32.mrb[15].mxu1 }
 0x1ee   : > { %v2426_v35 = vpop.f32.mrb[16].mxu1 }
 0x1ef   : > { %v2427_v37 = vpop.f32.mrb[17].mxu1 }
 0x1f0   : > { %v2428_v38 = vadd.f32 %v2427_v37, %v2426_v35  ;;  %v2429_v39 = vpop.f32.mrb[18].mxu1  ;;  %v3397_v37 = vrot.slane %v1200_v51, %v1212_v8 }
 0x1f1   : > { %v2430_v40 = vpop.f32.mrb[19].mxu1 }
 0x1f2   : > { %v2431_v41 = vadd.f32 %v2430_v40, %v2429_v39  ;;  %v1081_v15 = vadd.f32 %v2428_v38, %v790_v52 }
 0x1f4   : > { %v1084_v39 = vadd.f32 %v2431_v41, %v795_v27 }
 0x1f6   : > { %v2432_v43 = vpop.f32.mrb[20].mxu1 }
 0x1f7   : > { %v2433_v44 = vpop.f32.mrb[21].mxu1 }
 0x1f8   : > { %v2434_v45 = vadd.f32 %v2433_v44, %v2432_v43  ;;  %v2435_v47 = vpop.f32.mrb[22].mxu1  ;;  %v3400_v43 = vpop.permute.xlu0 %824 }
 0x1f9   : > { %v2436_v48 = vpop.f32.mrb[23].mxu1  ;;  %v3402_v44 = vpop.permute.xlu1 %819 }
 0x1fa   : > { %v2437_v25 = vadd.f32 %v2436_v48, %v2435_v47  ;;  %v1089_v12 = vadd.f32 %v2434_v45, %v800_v29 }
 0x1fc   : > { %v1092_v48 = vadd.f32 %v2437_v25, %v3384_v59 }
 0x1fe   : > { %v2438_v49 = vpop.f32.mrb[24].mxu1 }
 0x1ff   : > { %v2439_v50 = vpop.f32.mrb[25].mxu1 }
 0x200   : > { %v2440_v53 = vadd.f32 %v2439_v50, %v2438_v49  ;;  %v2441_v54 = vpop.f32.mrb[26].mxu1 }
 0x201   : > { %v2442_v55 = vpop.f32.mrb[27].mxu1 }
 0x202   : > { %v2443_v56 = vadd.f32 %v2442_v55, %v2441_v54  ;;  %v1097_v38 = vadd.f32 %v2440_v53, %v3388_v4 }
 0x206   : > { %v2444_v60 = vpop.f32.mrb[28].mxu1 }
 0x207   : > { %v2445_v61 = vpop.f32.mrb[29].mxu1 }
 0x208   : > { %v2446_v63 = vadd.f32 %v2445_v61, %v2444_v60  ;;  %v2447_v0 = vpop.f32.mrb[30].mxu1 }
 0x209   : > { %v2448_v2 = vpop.f32.mrb[31].mxu1 }
 0x20a   : > { %v2449_v42 = vadd.f32 %v2448_v2, %v2447_v0 }
 0x20c   : > { %v1108_v25 = vadd.f32 %v2449_v42, %v3400_v43 }
 0x20e   : > { %v934_v10 = vpop.f32.mrb[0].mxu0 }
 0x20f   : > { %v935_v62 = vadd.f32 %v934_v10, %v790_v52  ;;  %v936_v11 = vpop.f32.mrb[1].mxu0 }
 0x210   : > { %v937_v13 = vadd.f32 %v936_v11, %v790_v52  ;;  %v938_v9 = vpop.f32.mrb[2].mxu0 }
 0x211   : > { %v1008_v16 = vadd.f32 %v1007_v24, %v935_v62  ;;  %v939_v18 = vadd.f32 %v938_v9, %v795_v27  ;;  %v940_v35 = vpop.f32.mrb[3].mxu0 }
 0x212   : > { %v1010_v40 = vadd.f32 %v3354_v19, %v937_v13  ;;  %v941_v45 = vadd.f32 %v940_v35, %v795_v27  ;;  %v1100_v19 = vadd.f32 %v2443_v56, %v3386_v3  ;;  %v1105_v27 = vadd.f32 %v2446_v63, %v3402_v44 }
 0x213   : > { %v2512_v47 = vpop.f32.mrb[32].mxu1  ;;  %v1176_v49 = vmax.f32 %v1008_v16, 0.0  ;;  %v1012_v24 = vadd.f32 %v3356_v20, %v939_v18 }
 0x214   : > { %v1154_v50 = vadd.f32 %v2512_v47, %v1089_v12  ;;  %v1145_v52 = vpop.f32.mrb[33].mxu1  ;;  %v1177_v54 = vmax.f32 %v1010_v40, 0.0  ;;  %v1014_v41 = vadd.f32 %v3358_v21, %v941_v45 }
 0x215   : > { %v1146_v55 = vadd.f32 %v1145_v52, %v1081_v15  ;;  %v2513_v58 = vpop.f32.mrb[34].mxu1  ;;  %v1179_v60 = vmax.f32 %v1012_v24, 0.0  ;;  %v1217_v53 = vmul.f32 %v3393_v14, %v1176_v49 }
 0x216   : > { %v1184_v61 = vmax.f32 %v1154_v50, 0.0  ;;  %v1157_v0 = vadd.f32 %v2513_v58, %v1092_v48  ;;  %v1148_v20 = vpop.f32.mrb[35].mxu1  ;;  %v1180_v1 = vmax.f32 %v1014_v41, 0.0  ;;  %v944_v2 = vpop.f32.mrb[4].mxu0  ;;  %v1218_v10 = vmul.f32 %v3395_v17, %v1177_v54 }
 0x217   : > { %v1178_v5 = vmax.f32 %v1146_v55, 0.0  ;;  %v1149_v51 = vadd.f32 %v1148_v20, %v1084_v39  ;;  %v1220_v21 = vmul.f32 %v3393_v14, %v1179_v60  ;;  %v945_v7 = vadd.f32 %v944_v2, %v800_v29  ;;  %v946_v56 = vpop.f32.mrb[5].mxu0 }
 0x218   : > { %v1187_v8 = vmax.f32 %v1157_v0, 0.0  ;;  %v1221_v63 = vmul.f32 %v3395_v17, %v1180_v1  ;;  %v947_v62 = vadd.f32 %v946_v56, %v800_v29  ;;  %v948_v42 = vpop.f32.mrb[6].mxu0  ;;  %v1225_v11 = vmul.f32 %v3397_v37, %v1184_v61 }
 0x219   : > { %v1181_v12 = vmax.f32 %v1149_v51, 0.0  ;;  %v3416_v13 = vpack.c.bf16 %v1220_v21, %v1217_v53  ;;  %v1018_v9 = vadd.f32 %v3360_v22, %v945_v7  ;;  %v950_v15 = vpop.f32.mrb[7].mxu0  ;;  %v949_v39 = vadd.f32 %v948_v42, %v3384_v59 }
 0x21a   : > { %v1228_v16 = vmul.f32 %v3397_v37, %v1187_v8  ;;  %v3420_v18 = vpack.c.bf16 %v1221_v63, %v1218_v10  ;;  %v1020_v35 = vadd.f32 %v3362_v36, %v947_v62  ;;  %v1219_v40 = vmul.f32 %v3397_v37, %v1178_v5 }
 0x21b   : > { %v1222_v29 = vmul.f32 %v3397_v37, %v1181_v12  ;;  %v2516_v45 = vpop.f32.mrb[36].mxu1  ;;  %v1182_v47 = vmax.f32 %v1018_v9, 0.0  ;;  %v951_v48 = vadd.f32 %v950_v15, %v3384_v59  ;;  %1350 = vrot.lane.b32.xlu1 %v3416_v13, %s2864_s20  ;;  %1266 = vrot.lane.b32.xlu0 %v3416_v13, %s2866_s27  ;;  %v1022_v50 = vadd.f32 %v3364_v46, %v949_v39 }
 0x21c   : > { %v3431_v22 = vpack.c.bf16 %v1228_v16, %v1225_v11  ;;  %v1170_v49 = vadd.f32 %v2516_v45, %v1105_v27  ;;  %v1161_v36 = vpop.f32.mrb[37].mxu1  ;;  %v1183_v24 = vmax.f32 %v1020_v35, 0.0  ;;  %1565 = vmatprep.subr.bf16.mxu1 %v3420_v18 }
 0x21d   : > { %v3435_v52 = vpack.c.bf16 %v1222_v29, %v1219_v40  ;;  %v1162_v54 = vadd.f32 %v1161_v36, %v1097_v38  ;;  %v2517_v41 = vpop.f32.mrb[38].mxu1  ;;  %v1223_v59 = vmul.f32 %v3393_v14, %v1182_v47  ;;  %v1024_v55 = vadd.f32 %v3366_v23, %v951_v48  ;;  %1566 = vmatpush1.bf16.msra.mxu1 %v3416_v13 }
 0x21e   : > { %v1196_v58 = vmax.f32 %v1170_v49, 0.0  ;;  %v1173_v60 = vadd.f32 %v2517_v41, %v1108_v25  ;;  %v1164_v61 = vpop.f32.mrb[39].mxu1  ;;  %v1224_v27 = vmul.f32 %v3395_v17, %v1183_v24  ;;  %v1185_v0 = vmax.f32 %v1022_v50, 0.0  ;;  %v954_v20 = vpop.f32.mrb[8].mxu0  ;;  %1259 = vst.msk [vmem:[#allocation3 + $0x28] sm:$0xff] %vm1255_vm10, %v3431_v22 }
 0x21f   : > { %v1190_v46 = vmax.f32 %v1162_v54, 0.0  ;;  %v1165_v53 = vadd.f32 %v1164_v61, %v1100_v19  ;;  %v1186_v38 = vmax.f32 %v1024_v55, 0.0  ;;  %v955_v1 = vadd.f32 %v954_v20, %v3388_v4  ;;  %v956_v2 = vpop.f32.mrb[9].mxu0  ;;  %1406 = vrot.lane.b32.xlu1 %v3416_v13, %s2867_s28  ;;  %1294 = vrot.lane.b32.xlu0 %v3416_v13, %s2868_s29  ;;  %1256 = vst.msk [vmem:[#allocation3 + $0x10] sm:$0xff] %vm1255_vm10, %v3435_v52 }
 0x220   : > { %v1237_v23 = vmul.f32 %v3397_v37, %v1196_v58  ;;  %v1199_v25 = vmax.f32 %v1173_v60, 0.0  ;;  %v1226_v5 = vmul.f32 %v3393_v14, %v1185_v0  ;;  %v957_v19 = vadd.f32 %v956_v2, %v3388_v4  ;;  %v958_v51 = vpop.f32.mrb[10].mxu0 }
 0x221   : > { %v1231_v21 = vmul.f32 %v3397_v37, %v1190_v46  ;;  %v1193_v7 = vmax.f32 %v1165_v53, 0.0  ;;  %v1227_v56 = vmul.f32 %v3395_v17, %v1186_v38  ;;  %v1028_v8 = vadd.f32 %v3368_v26, %v955_v1  ;;  %v960_v10 = vpop.f32.mrb[11].mxu0 }
 0x222   : > { %v1240_v63 = vmul.f32 %v3397_v37, %v1199_v25  ;;  %v3457_v62 = vpack.c.bf16 %v1226_v5, %v1223_v59  ;;  %v1030_v42 = vadd.f32 %v3370_v57, %v957_v19  ;;  %v959_v11 = vadd.f32 %v958_v51, %v3386_v3 }
 0x223   : > { %v1234_v12 = vmul.f32 %v3397_v37, %v1193_v7  ;;  %v3462_v4 = vpack.c.bf16 %v1227_v56, %v1224_v27  ;;  %v961_v9 = vadd.f32 %v960_v10, %v3386_v3  ;;  %1434 = vrot.lane.b32.xlu1 %v3416_v13, %s2869_s21  ;;  %1322 = vrot.lane.b32.xlu0 %v3416_v13, %s2870_s26  ;;  %v1188_v15 = vmax.f32 %v1028_v8, 0.0 }
 0x224   : > { %v3469_v26 = vpack.c.bf16 %v1240_v63, %v1237_v23  ;;  %v1032_v16 = vadd.f32 %v3372_v28, %v959_v11  ;;  %v1189_v35 = vmax.f32 %v1030_v42, 0.0 }
 0x225   : > { %v3472_v57 = vpack.c.bf16 %v1234_v12, %v1231_v21  ;;  %v1034_v37 = vadd.f32 %v3374_v30, %v961_v9  ;;  %1567 = vmatprep.subr.bf16.mxu1 %v3462_v4  ;;  %v3476_v39 = vld [vmem:[#allocation3 + $0x28] sm:$0xff]  ;;  %v1229_v30 = vmul.f32 %v3393_v14, %v1188_v15 }
 0x226   : > { %v1191_v3 = vmax.f32 %v1032_v16, 0.0  ;;  %v964_v40 = vpop.f32.mrb[12].mxu0  ;;  %1568 = vmatpush1.bf16.msra.mxu1 %v3457_v62  ;;  %v3479_v29 = vld [vmem:[#allocation3 + $0x10] sm:$0xff]  ;;  %1735 = vst.msk [vmem:[#allocation3 + $0x28] sm:$0xff] %vm1255_vm10, %v3469_v26  ;;  %v1230_v24 = vmul.f32 %v3395_v17, %v1189_v35 }
 0x227   : > { %v1192_v45 = vmax.f32 %v1034_v37, 0.0  ;;  %v965_v28 = vadd.f32 %v964_v40, %v3402_v44  ;;  %v966_v47 = vpop.f32.mrb[13].mxu0  ;;  %1352 = vrot.lane.b32.xlu1 %v3420_v18, %s2864_s20  ;;  %1378 = vrot.lane.b32.xlu0 %v3416_v13, %s4109_s25  ;;  %1732 = vst.msk [vmem:[#allocation3 + $0x10] sm:$0xff] %vm1255_vm10, %v3472_v57 }
 0x228   : > { %v1232_v48 = vmul.f32 %v3393_v14, %v1191_v3  ;;  %v967_v49 = vadd.f32 %v966_v47, %v3402_v44  ;;  %v968_v36 = vpop.f32.mrb[14].mxu0 }
 0x229   : > { %v1233_v50 = vmul.f32 %v3395_v17, %v1192_v45  ;;  %v1038_v54 = vadd.f32 %v3376_v31, %v965_v28  ;;  %v969_v41 = vadd.f32 %v968_v36, %v3400_v43  ;;  %v970_v59 = vpop.f32.mrb[15].mxu0 }
 0x22a   : > { %v3497_v55 = vpack.c.bf16 %v1232_v48, %v1229_v30  ;;  %v1040_v58 = vadd.f32 %v3378_v32, %v967_v49  ;;  %v971_v60 = vadd.f32 %v970_v59, %v3400_v43 }
 0x22b   : > { %v3501_v61 = vpack.c.bf16 %v1233_v50, %v1230_v24  ;;  %v1194_v27 = vmax.f32 %v1038_v54, 0.0  ;;  %v1042_v44 = vadd.f32 %v3380_v33, %v969_v41  ;;  %1380 = vrot.lane.b32.xlu1 %v3420_v18, %s4109_s25  ;;  %1268 = vrot.lane.b32.xlu0 %v3420_v18, %s2866_s27 }
 0x22c   : > { %v1195_v31 = vmax.f32 %v1040_v58, 0.0  ;;  %v1044_v0 = vadd.f32 %v3382_v34, %v971_v60  ;;  %v3604_v34 = vld [vmem:[%s4079_s4] sm:$0xff] }
 0x22d   : > { %v1197_v20 = vmax.f32 %v1042_v44, 0.0  ;;  %v1235_v32 = vmul.f32 %v3393_v14, %v1194_v27 }
 0x22e   : > { %v1198_v46 = vmax.f32 %v1044_v0, 0.0  ;;  %v1236_v33 = vmul.f32 %v3395_v17, %v1195_v31 }
 0x22f   : > { %v1238_v43 = vmul.f32 %v3393_v14, %v1197_v20  ;;  %1386 = vrot.lane.b32.xlu1 %v3462_v4, %s4109_s25  ;;  %1296 = vrot.lane.b32.xlu0 %v3420_v18, %s2868_s29  ;;  %v2396_v14 = vcombine.high %v3604_v34, %v3604_v34 }
 0x230   : > { %v1239_v53 = vmul.f32 %v3395_v17, %v1198_v46 }
 0x231   : > { %v3517_v38 = vpack.c.bf16 %v1238_v43, %v1235_v32  ;;  %1679 = vmatprep.mubr.bf16.mxu0 %v2396_v14  ;;  %1597 = vmatprep.mubr.bf16.mxu1 %v2396_v14  ;;  %v1546_v14 = vld [vmem:[%s4080_s5] sm:$0xff] }
 0x232   : > { %v3519_v1 = vpack.c.bf16 %v1239_v53, %v1236_v33 }
 0x233   : > { %1414 = vrot.lane.b32.xlu1 %v3462_v4, %s2867_s28  ;;  %1324 = vrot.lane.b32.xlu0 %v3420_v18, %s2870_s26 }
 0x237   : > { %1442 = vrot.lane.b32.xlu1 %v3462_v4, %s2869_s21  ;;  %1408 = vrot.lane.b32.xlu0 %v3420_v18, %s2867_s28 }
 0x23b   : > { %1470 = vrot.lane.b32.xlu1 %v3462_v4, %s4110_s19  ;;  %1436 = vrot.lane.b32.xlu0 %v3420_v18, %s2869_s21 }
 0x23f   : > { %1468 = vrot.lane.b32.xlu1 %v3457_v62, %s4110_s19  ;;  %1272 = vrot.lane.b32.xlu0 %v3457_v62, %s2866_s27 }
 0x243   : > { %1388 = vrot.lane.b32.xlu1 %v3431_v22, %s4109_s25  ;;  %1300 = vrot.lane.b32.xlu0 %v3457_v62, %s2868_s29 }
 0x247   : > { %1276 = vrot.lane.b32.xlu1 %v3431_v22, %s2866_s27  ;;  %1328 = vrot.lane.b32.xlu0 %v3457_v62, %s2870_s26 }
 0x24b   : > { %1416 = vrot.lane.b32.xlu1 %v3431_v22, %s2867_s28  ;;  %1356 = vrot.lane.b32.xlu0 %v3457_v62, %s2864_s20 }
 0x24f   : > { %1304 = vrot.lane.b32.xlu1 %v3431_v22, %s2868_s29  ;;  %1384 = vrot.lane.b32.xlu0 %v3457_v62, %s4109_s25 }
 0x253   : > { %1444 = vrot.lane.b32.xlu1 %v3431_v22, %s2869_s21  ;;  %1412 = vrot.lane.b32.xlu0 %v3457_v62, %s2867_s28 }
 0x257   : > { %1332 = vrot.lane.b32.xlu1 %v3431_v22, %s2870_s26  ;;  %1440 = vrot.lane.b32.xlu0 %v3457_v62, %s2869_s21 }
 0x25b   : > { %1472 = vrot.lane.b32.xlu1 %v3431_v22, %s4110_s19  ;;  %1274 = vrot.lane.b32.xlu0 %v3462_v4, %s2866_s27 }
 0x25f   : > { %1354 = vrot.lane.b32.xlu1 %v3435_v52, %s2864_s20  ;;  %1302 = vrot.lane.b32.xlu0 %v3462_v4, %s2868_s29 }
 0x263   : > { %1382 = vrot.lane.b32.xlu1 %v3435_v52, %s4109_s25  ;;  %1330 = vrot.lane.b32.xlu0 %v3462_v4, %s2870_s26 }
 0x267   : > { %1270 = vrot.lane.b32.xlu1 %v3435_v52, %s2866_s27  ;;  %1358 = vrot.lane.b32.xlu0 %v3462_v4, %s2864_s20 }
 0x26b   : > { %1410 = vrot.lane.b32.xlu1 %v3435_v52, %s2867_s28  ;;  %1360 = vrot.lane.b32.xlu0 %v3431_v22, %s2864_s20 }
 0x26f   : > { %1298 = vrot.lane.b32.xlu1 %v3435_v52, %s2868_s29  ;;  %1464 = vrot.lane.b32.xlu0 %v3420_v18, %s4110_s19 }
 0x273   : > { %1438 = vrot.lane.b32.xlu1 %v3435_v52, %s2869_s21  ;;  %1462 = vrot.lane.b32.xlu0 %v3416_v13, %s4110_s19 }
 0x277   : > { %1326 = vrot.lane.b32.xlu1 %v3435_v52, %s2870_s26  ;;  %1466 = vrot.lane.b32.xlu0 %v3435_v52, %s4110_s19 }
 0x27b   : > { %1742 = vrot.lane.b32.xlu1 %v3497_v55, %s2866_s27  ;;  %1826 = vrot.lane.b32.xlu0 %v3497_v55, %s2864_s20 }
 0x27f   : > { %1770 = vrot.lane.b32.xlu1 %v3497_v55, %s2868_s29  ;;  %1746 = vrot.lane.b32.xlu0 %v3472_v57, %s2866_s27 }
 0x283   : > { %1798 = vrot.lane.b32.xlu1 %v3497_v55, %s2870_s26  ;;  %1774 = vrot.lane.b32.xlu0 %v3472_v57, %s2868_s29 }
 0x287   : > { %1744 = vrot.lane.b32.xlu1 %v3501_v61, %s2866_s27  ;;  %1802 = vrot.lane.b32.xlu0 %v3472_v57, %s2870_s26 }
 0x28b   : > { %1772 = vrot.lane.b32.xlu1 %v3501_v61, %s2868_s29  ;;  %1830 = vrot.lane.b32.xlu0 %v3472_v57, %s2864_s20 }
 0x28d   : > { %v1351_v17 = vpop.permute.xlu1 %1350  ;;  %v3620_v13 = vpop.permute.xlu0 %1266 }
 0x28f   : > { %1800 = vrot.lane.b32.xlu1 %v3501_v61, %s2870_s26  ;;  %1748 = vrot.lane.b32.xlu0 %v3517_v38, %s2866_s27 }
 0x291   : > { %v1407_v18 = vpop.permute.xlu1 %1406  ;;  %v1295_v22 = vpop.permute.xlu0 %1294 }
 0x293   : > { %1828 = vrot.lane.b32.xlu1 %v3501_v61, %s2864_s20  ;;  %1776 = vrot.lane.b32.xlu0 %v3517_v38, %s2868_s29 }
 0x295   : > { %v1435_v52 = vpop.permute.xlu1 %1434  ;;  %v3630_v2 = vpop.permute.xlu0 %1322 }
 0x297   : > { %1752 = vrot.lane.b32.xlu1 %v3469_v26, %s2866_s27  ;;  %1750 = vrot.lane.b32.xlu0 %v3519_v1, %s2866_s27 }
 0x299   : > { %v3636_v23 = vpop.permute.xlu1 %1352  ;;  %v1379_v25 = vpop.permute.xlu0 %1378 }
 0x29a   : > { %v3640_v5 = vsel %vm552_vm8, %v1351_v17, %v3636_v23 }
 0x29b   : > { %1780 = vrot.lane.b32.xlu1 %v3469_v26, %s2868_s29  ;;  %1832 = vrot.lane.b32.xlu0 %v3517_v38, %s2864_s20 }
 0x29d   : > { %v3646_v19 = vpop.permute.xlu1 %1380  ;;  %v3648_v51 = vpop.permute.xlu0 %1268 }
 0x29e   : > { %v3652_v21 = vsel %vm581_vm9, %v1379_v25, %v3646_v19 }
 0x29f   : > { %1808 = vrot.lane.b32.xlu1 %v3469_v26, %s2870_s26  ;;  %1778 = vrot.lane.b32.xlu0 %v3519_v1, %s2868_s29  ;;  %s3997_s29 = scalar_lea.hbm %s4084_s9, %s2579_s30 }
 0x2a1   : > { %v3658_v7 = vpop.permute.xlu1 %1386  ;;  %v3660_v56 = vpop.permute.xlu0 %1296 }
 0x2a2   : > { %v3664_v8 = vsel %vm494_vm5, %v1295_v22, %v3660_v56 }
 0x2a3   : > { %1836 = vrot.lane.b32.xlu1 %v3469_v26, %s2864_s20  ;;  %1858 = vrot.lane.b32.xlu0 %v3472_v57, %s4109_s25 }
 0x2a5   : > { %v1415_v10 = vpop.permute.xlu1 %1414  ;;  %v3670_v63 = vpop.permute.xlu0 %1324 }
 0x2a7   : > { %1804 = vrot.lane.b32.xlu1 %v3517_v38, %s2870_s26  ;;  %1806 = vrot.lane.b32.xlu0 %v3519_v1, %s2870_s26 }
 0x2a9   : > { %v1443_v62 = vpop.permute.xlu1 %1442  ;;  %v3676_v42 = vpop.permute.xlu0 %1408 }
 0x2aa   : > { %v3680_v11 = vsel %vm620_vm4, %v1407_v18, %v3676_v42 }
 0x2ab   : > { %1856 = vrot.lane.b32.xlu1 %v3501_v61, %s4109_s25  ;;  %1860 = vrot.lane.b32.xlu0 %v3517_v38, %s4109_s25 }
 0x2ad   : > { %v1471_v12 = vpop.permute.xlu1 %1470  ;;  %v3686_v4 = vpop.permute.xlu0 %1436 }
 0x2ae   : > { %v3690_v9 = vsel %vm655_vm6, %v1435_v52, %v3686_v4 }
 0x2af   : > { %1854 = vrot.lane.b32.xlu1 %v3497_v55, %s4109_s25  ;;  %1834 = vrot.lane.b32.xlu0 %v3519_v1, %s2864_s20 }
 0x2b1   : > { %v1469_v15 = vpop.permute.xlu1 %1468  ;;  %v3696_v16 = vpop.permute.xlu0 %1272 }
 0x2b2   : > { %v3699_v35 = vsel %vm690_vm1, %v1469_v15, %v1471_v12 }
 0x2b3   : > { %1864 = vrot.lane.b32.xlu1 %v3469_v26, %s4109_s25  ;;  %1886 = vrot.lane.b32.xlu0 %v3472_v57, %s2867_s28 }
 0x2b5   : > { %v1389_v37 = vpop.permute.xlu1 %1388  ;;  %v3705_v3 = vpop.permute.xlu0 %1300 }
 0x2b6   : > { %v3709_v40 = vsel %vm581_vm9, %v3658_v7, %v1389_v37  ;;  %1405 = vst.msk [vmem:[#allocation3 + $0x118] sm:$0xff] %vm1255_vm10, %v1389_v37 }
 0x2b7   : > { %1884 = vrot.lane.b32.xlu1 %v3501_v61, %s2867_s28  ;;  %1862 = vrot.lane.b32.xlu0 %v3519_v1, %s4109_s25 }
 0x2b9   : > { %v1277_v45 = vpop.permute.xlu1 %1276  ;;  %v3716_v28 = vpop.permute.xlu0 %1328 }
 0x2ba   : > { %1293 = vst.msk [vmem:[#allocation3 + $0x58] sm:$0xff] %vm1255_vm10, %v1277_v45 }
 0x2bb   : > { %1882 = vrot.lane.b32.xlu1 %v3497_v55, %s2867_s28  ;;  %1888 = vrot.lane.b32.xlu0 %v3517_v38, %s2867_s28 }
 0x2bd   : > { %v1417_v47 = vpop.permute.xlu1 %1416  ;;  %v3723_v30 = vpop.permute.xlu0 %1356 }
 0x2be   : > { %v3726_v48 = vsel %vm620_vm4, %v1415_v10, %v1417_v47  ;;  %1433 = vst.msk [vmem:[#allocation3 + $0x148] sm:$0xff] %vm1255_vm10, %v1417_v47 }
 0x2bf   : > { %1892 = vrot.lane.b32.xlu1 %v3469_v26, %s2867_s28  ;;  %1890 = vrot.lane.b32.xlu0 %v3519_v1, %s2867_s28 }
 0x2c1   : > { %v1305_v49 = vpop.permute.xlu1 %1304  ;;  %v3733_v36 = vpop.permute.xlu0 %1384 }
 0x2c2   : > { %1321 = vst.msk [vmem:[#allocation3 + $0x88] sm:$0xff] %vm1255_vm10, %v1305_v49 }
 0x2c3   : > { %1912 = vrot.lane.b32.xlu1 %v3501_v61, %s2869_s21  ;;  %1914 = vrot.lane.b32.xlu0 %v3472_v57, %s2869_s21 }
 0x2c5   : > { %v1445_v24 = vpop.permute.xlu1 %1444  ;;  %v1413_v50 = vpop.permute.xlu0 %1412 }
 0x2c6   : > { %v3741_v54 = vsel %vm655_vm6, %v1443_v62, %v1445_v24  ;;  %1461 = vst.msk [vmem:[#allocation3 + $0x178] sm:$0xff] %vm1255_vm10, %v1445_v24  ;;  %v3745_v41 = vsel %vm620_vm4, %v1413_v50, %v1415_v10 }
 0x2c7   : > { %1910 = vrot.lane.b32.xlu1 %v3497_v55, %s2869_s21  ;;  %1918 = vrot.lane.b32.xlu0 %v3519_v1, %s2869_s21 }
 0x2c9   : > { %v3751_v59 = vpop.permute.xlu1 %1332  ;;  %v1441_v58 = vpop.permute.xlu0 %1440 }
 0x2ca   : > { %1349 = vst.msk [vmem:[#allocation3 + $0xb8] sm:$0xff] %vm1255_vm10, %v3751_v59  ;;  %v3756_v60 = vsel %vm655_vm6, %v1441_v58, %v1443_v62  ;;  %v1503_v58 = vld [vmem:[#allocation3 + $0x58] sm:$0xff] }
 0x2cb   : > { %1920 = vrot.lane.b32.xlu1 %v3469_v26, %s2869_s21  ;;  %1916 = vrot.lane.b32.xlu0 %v3517_v38, %s2869_s21  ;;  %s2212_s21 = scalar_lea.sflag [#allocation7], %s3072_s23 }
 0x2cd   : > { %v1473_v27 = vpop.permute.xlu1 %1472  ;;  %v1275_v44 = vpop.permute.xlu0 %1274 }
 0x2ce   : > { %v3763_v31 = vsel %vm690_vm1, %v1471_v12, %v1473_v27  ;;  %1489 = vst.msk [vmem:[#allocation3 + $0x1a8] sm:$0xff] %vm1255_vm10, %v1473_v27  ;;  %v1281_v18 = vsel %vm465_vm3, %v1275_v44, %v1277_v45 }
 0x2cf   : > { %1940 = vrot.lane.b32.xlu1 %v3501_v61, %s4110_s19  ;;  %1942 = vrot.lane.b32.xlu0 %v3472_v57, %s4110_s19  ;;  %v2022_v57 = vld [vmem:[%s4082_s7] sm:$0xff] }
 0x2d1   : > { %v3770_v0 = vpop.permute.xlu1 %1354  ;;  %v1303_v20 = vpop.permute.xlu0 %1302 }
 0x2d2   : > { %1374 = vst.msk [vmem:[#allocation3 + $0xd0] sm:$0xff] %vm1255_vm10, %v3770_v0 }
 0x2d3   : > { %1938 = vrot.lane.b32.xlu1 %v3497_v55, %s4110_s19  ;;  %1946 = vrot.lane.b32.xlu0 %v3519_v1, %s4110_s19 }
 0x2d5   : > { %v3778_v46 = vpop.permute.xlu1 %1382  ;;  %v3780_v32 = vpop.permute.xlu0 %1330 }
 0x2d6   : > { %1402 = vst.msk [vmem:[#allocation3 + $0x100] sm:$0xff] %vm1255_vm10, %v3778_v46 }
 0x2d7   : > { %1948 = vrot.lane.b32.xlu1 %v3469_v26, %s4110_s19  ;;  %1944 = vrot.lane.b32.xlu0 %v3517_v38, %s4110_s19  ;;  %v1278_v26 = vsel %vm465_vm3, %v3620_v13, %v3648_v51  ;;  %s2578_s19 = smul.u32 24, %s3072_s23 }
 0x2d9   : > { %v1271_v43 = vpop.permute.xlu1 %1270  ;;  %v3791_v33 = vpop.permute.xlu0 %1358  ;;  %v1518_v53 = vld [vmem:[#allocation3 + $0xd0] sm:$0xff]  ;;  %s397_s24 = scalar_lea.vmem [#allocation10], %s2578_s19 }
 0x2da   : > { %v1279_v17 = vsel %vm465_vm3, %v3648_v51, %v1271_v43  ;;  %1290 = vst.msk [vmem:[#allocation3 + $0x40] sm:$0xff] %vm1255_vm10, %v1271_v43  ;;  %2456 = vmatprep.subr.bf16.mxu0 %v1518_v53  ;;  %v1309_v51 = vsel %vm494_vm5, %v1303_v20, %v1305_v49  ;;  %v1337_v49 = vsel %vm523_vm7, %v3780_v32, %v3751_v59  ;;  %s2231_s20 = sshll.u32 %s397_s24, 4  ;;  %s3999_s20 = int_to_ptr.vmem [resolvable:$true] %s2231_s20 }
 0x2db   : > { %2025 = vperm.xlu1 %2659, %v2022_v57   ;;  %2457 = vmatpush3.bf16.msra.mxu0 %v3479_v29  ;;  %v1280_v29 = vsel %vm465_vm3, %v3696_v16, %v1275_v44  ;;  %v1308_v16 = vsel %vm494_vm5, %v3705_v3, %v1303_v20  ;;  %v1334_v3 = vsel %vm523_vm7, %v3630_v2, %v3670_v63  ;;  %v1533_v57 = vld [vmem:[#allocation3 + $0x148] sm:$0xff]  ;;  %s2752_s26 = scalar_lea.vmem %s3999_s20, 384  ;;  %p2759_p10 = scmp.lt.s32.totalorder %s3999_s20, %s2757_s12 }
 0x2dc   : > { %1549 = vperm.xlu0 %2658, %v1546_v14   ;;  %1569 = vmatprep.subr.bf16.mxu1 %v1279_v17  ;;  %v1336_v44 = vsel %vm523_vm7, %v3716_v28, %v3780_v32  ;;  %v1363_v2 = vsel %vm552_vm8, %v3636_v23, %v3770_v0  ;;  %v1509_v23 = vld [vmem:[#allocation3 + $0x88] sm:$0xff]  ;;  %v1364_v32 = vsel %vm552_vm8, %v3723_v30, %v3791_v33  ;;  %p2753_p4 = scmp.ne.s32.totalorder %s3999_s20, %s2752_s26  ;;  %p2760_p13 = scmp.lt.s32.totalorder %s2758_s11, %s2752_s26 }
 0x2dd   : > { %v3804_v22 = vpop.permute.xlu1 %1410  ;;  %v1361_v52 = vpop.permute.xlu0 %1360  ;;  %1570 = vmatpush1.bf16.msra.mxu1 %v1278_v26  ;;  %v1391_v14 = vsel %vm581_vm9, %v3646_v19, %v3778_v46 }
 0x2de   : > { %1430 = vst.msk [vmem:[#allocation3 + $0x130] sm:$0xff] %vm1255_vm10, %v3804_v22  ;;  %1377 = vst.msk [vmem:[#allocation3 + $0xe8] sm:$0xff] %vm1255_vm10, %v1361_v52  ;;  %1571 = vmatprep.subr.bf16.mxu1 %v1281_v18  ;;  %v1365_v43 = vsel %vm552_vm8, %v3791_v33, %v1361_v52  ;;  %p2754_p6 = pnand %p2753_p4, %p3024_p12  ;;  %p2761_p3 = por %p2760_p13, %p2759_p10 }
 0x2e0   : > { %p2755_p8 = pneg %p2754_p6 }
 0x2e1   : > { %v1299_v25 = vpop.permute.xlu1 %1298  ;;  %v3811_v10 = vpop.permute.xlu0 %1464  ;;  %1572 = vmatpush1.bf16.msra.mxu1 %v1280_v29  ;;  %v1539_v29 = vld [vmem:[#allocation3 + $0x178] sm:$0xff] }
 0x2e2   : > { %v1307_v13 = vsel %vm494_vm5, %v3660_v56, %v1299_v25  ;;  %1318 = vst.msk [vmem:[#allocation3 + $0x70] sm:$0xff] %vm1255_vm10, %v1299_v25  ;;  %v1524_v56 = vld [vmem:[#allocation3 + $0x100] sm:$0xff]  ;;  %v1515_v25 = vld [vmem:[#allocation3 + $0xb8] sm:$0xff]  ;;  %p2762_p7 = pnand %p2761_p3, %p2755_p8 }
 0x2e3   : > { %1573 = vmatprep.subr.bf16.mxu1 %v1307_v13  ;;  %v2395_v13 = vcombine.low %v3604_v34, %v3604_v34 }
 0x2e5   : > { %v3817_v62 = vpop.permute.xlu1 %1438  ;;  %v3819_v12 = vpop.permute.xlu0 %1462  ;;  %v1521_v15 = vld [vmem:[#allocation3 + $0xe8] sm:$0xff]  ;;  %1574 = vmatpush1.bf16.msra.mxu1 %v3664_v8  ;;  %v1500_v8 = vld [vmem:[#allocation3 + $0x40] sm:$0xff]  ;;  %v1530_v27 = vld [vmem:[#allocation3 + $0x130] sm:$0xff] }
 0x2e6   : > { %1458 = vst.msk [vmem:[#allocation3 + $0x160] sm:$0xff] %vm1255_vm10, %v3817_v62  ;;  %2458 = vmatprep.subr.bf16.mxu0 %v1521_v15  ;;  %1575 = vmatprep.subr.bf16.mxu1 %v1309_v51  ;;  %v1392_v51 = vsel %vm581_vm9, %v3733_v36, %v3658_v7  ;;  %v1419_v15 = vsel %vm620_vm4, %v3676_v42, %v3804_v22  ;;  %v3894_v7 = vld [vmem:[%s4081_s6] sm:$0xff] }
 0x2e7   : > { %2459 = vmatpush3.bf16.msra.mxu0 %v3476_v39  ;;  %v1527_v39 = vld [vmem:[#allocation3 + $0x118] sm:$0xff] }
 0x2e8   : > { %2460 = vmatprep.subr.bf16.mxu0 %v1524_v56 }
 0x2e9   : > { %v1327_v37 = vpop.permute.xlu1 %1326  ;;  %v3827_v45 = vpop.permute.xlu0 %1466  ;;  %1576 = vmatpush1.bf16.msra.mxu1 %v1308_v16  ;;  %v1506_v59 = vld [vmem:[#allocation3 + $0x70] sm:$0xff] }
 0x2ea   : > { %v1335_v47 = vsel %vm523_vm7, %v3670_v63, %v1327_v37  ;;  %1346 = vst.msk [vmem:[#allocation3 + $0xa0] sm:$0xff] %vm1255_vm10, %v1327_v37  ;;  %1486 = vst.msk [vmem:[#allocation3 + $0x190] sm:$0xff] %vm1255_vm10, %v3827_v45 }
 0x2eb   : > { %2461 = vmatpush3.bf16.msra.mxu0 %v1500_v8  ;;  %1577 = vmatprep.subr.bf16.mxu1 %v1335_v47  ;;  %v1545_v8 = vld [vmem:[#allocation3 + $0x1a8] sm:$0xff] }
 0x2ec   : > { %2462 = vmatprep.subr.bf16.mxu0 %v1527_v39  ;;  %v2690_v39 = vld [vmem:[%s4079_s4 + $0x8] ss:$0 sps:$4 sm:$0xff]  }
 0x2ed   : > { %v1743_v24 = vpop.permute.xlu1 %1742  ;;  %v3840_v50 = vpop.permute.xlu0 %1826  ;;  %1578 = vmatpush1.bf16.msra.mxu1 %v1334_v3  ;;  %v1536_v0 = vld [vmem:[#allocation3 + $0x160] sm:$0xff]  ;;  %v2401_v3 = vcombine.high %v3894_v7, %v3894_v7 }
 0x2ee   : > { %1579 = vmatprep.subr.bf16.mxu1 %v1337_v49 }
 0x2ef   : > { %2463 = vmatpush3.bf16.msra.mxu0 %v1503_v58 }
 0x2f0   : > { %2464 = vmatprep.subr.bf16.mxu0 %v1530_v27 }
 0x2f1   : > { %v1771_v63 = vpop.permute.xlu1 %1770  ;;  %v1747_v20 = vpop.permute.xlu0 %1746  ;;  %1580 = vmatpush1.bf16.msra.mxu1 %v1336_v44  ;;  %v1512_v18 = vld [vmem:[#allocation3 + $0xa0] sm:$0xff] }
 0x2f2   : > { %1766 = vst.msk [vmem:[#allocation3 + $0x40] sm:$0xff] %vm1255_vm10, %v1747_v20  ;;  %1581 = vmatprep.subr.bf16.mxu1 %v1363_v2 }
 0x2f3   : > { %2465 = vmatpush3.bf16.msra.mxu0 %v1506_v59 }
 0x2f4   : > { %2466 = vmatprep.subr.bf16.mxu0 %v1533_v57 }
 0x2f5   : > { %v1799_v53 = vpop.permute.xlu1 %1798  ;;  %v1775_v28 = vpop.permute.xlu0 %1774  ;;  %1582 = vmatpush1.bf16.msra.mxu1 %v3640_v5 }
 0x2f6   : > { %1794 = vst.msk [vmem:[#allocation3 + $0x70] sm:$0xff] %vm1255_vm10, %v1775_v28  ;;  %1583 = vmatprep.subr.bf16.mxu1 %v1365_v43 }
 0x2f7   : > { %2467 = vmatpush3.bf16.msra.mxu0 %v1509_v23 }
 0x2f8   : > { %2468 = vmatprep.subr.bf16.mxu0 %v1536_v0 }
 0x2f9   : > { %v1745_v17 = vpop.permute.xlu1 %1744  ;;  %v1803_v26 = vpop.permute.xlu0 %1802  ;;  %1584 = vmatpush1.bf16.msra.mxu1 %v1364_v32 }
 0x2fa   : > { %v3860_v5 = vsel %vm465_vm3, %v1743_v24, %v1745_v17  ;;  %v1755_v52 = vsel %vm465_vm3, %v1745_v17, %v1747_v20  ;;  %1822 = vst.msk [vmem:[#allocation3 + $0xa0] sm:$0xff] %vm1255_vm10, %v1803_v26  ;;  %1585 = vmatprep.subr.bf16.mxu1 %v1391_v14  ;;  %v1976_v14 = vld [vmem:[#allocation3 + $0x40] sm:$0xff] }
 0x2fb   : > { %2469 = vmatpush3.bf16.msra.mxu0 %v1512_v18 }
 0x2fc   : > { %2470 = vmatprep.subr.bf16.mxu0 %v1539_v29 }
 0x2fd   : > { %v1773_v30 = vpop.permute.xlu1 %1772  ;;  %v1831_v33 = vpop.permute.xlu0 %1830  ;;  %1586 = vmatpush1.bf16.msra.mxu1 %v3652_v21  ;;  %v2871_v21 = vmov 0.0  }
 0x2fe   : > { %v3866_v19 = vsel %vm494_vm5, %v1771_v63, %v1773_v30  ;;  %v3869_v46 = vsel %vm494_vm5, %v1773_v30, %v1775_v28  ;;  %1850 = vst.msk [vmem:[#allocation3 + $0xd0] sm:$0xff] %vm1255_vm10, %v1831_v33  ;;  %1587 = vmatprep.subr.bf16.mxu1 %v3709_v40  ;;  %v1542_v40 = vld [vmem:[#allocation3 + $0x190] sm:$0xff]  ;;  %v1973_v28 = vld [vmem:[#allocation3 + $0x28] sm:$0xff] }
 0x2ff   : > { %2471 = vmatpush3.bf16.msra.mxu0 %v1515_v25  ;;  %v1970_v63 = vld [vmem:[#allocation3 + $0x10] sm:$0xff] }
 0x300   : > { %2518 = vmatprep.subr.bf16.mxu0 %v2871_v21 }
 0x301   : > { %v1801_v56 = vpop.permute.xlu1 %1800  ;;  %v1749_v16 = vpop.permute.xlu0 %1748  ;;  %1588 = vmatpush1.bf16.msra.mxu1 %v1392_v51 }
 0x302   : > { %v3883_v37 = vsel %vm523_vm7, %v1799_v53, %v1801_v56  ;;  %v3886_v34 = vsel %vm523_vm7, %v1801_v56, %v1803_v26  ;;  %1680 = vmatmul.mubr.bf16.vlgmr.msra.gmra.mrb[16].mxu0 %v2395_v13  ;;  %1589 = vmatprep.subr.bf16.mxu1 %v1419_v15 }
 0x303   : > { %2519 = vmatpush3.bf16.msra.mxu0 %v1542_v40  ;;  %2522 = vmatprep.mubr.msk.bf16.mxu0 %vm2872_vm11, %v2871_v21 }
 0x304   : > { %2520 = vmatprep.subr.bf16.mxu0 %v2871_v21 }
 0x305   : > { %v1829_v42 = vpop.permute.xlu1 %1828  ;;  %v1777_v36 = vpop.permute.xlu0 %1776  ;;  %1590 = vmatpush1.bf16.msra.mxu1 %v3680_v11  ;;  %v1447_v11 = vsel %vm655_vm6, %v3686_v4, %v3817_v62 }
 0x306   : > { %v3899_v22 = vsel %vm552_vm8, %v3840_v50, %v1829_v42  ;;  %v3902_v47 = vsel %vm552_vm8, %v1829_v42, %v1831_v33  ;;  %1591 = vmatprep.subr.bf16.mxu1 %v3726_v48 }
 0x307   : > { %2521 = vmatpush3.bf16.msra.mxu0 %v1545_v8 }
 0x308   : > { %2041 = vmatprep.subr.bf16.mxu0 %v3501_v61 }
 0x309   : > { %v1753_v49 = vpop.permute.xlu1 %1752  ;;  %v1751_v24 = vpop.permute.xlu0 %1750  ;;  %1592 = vmatpush1.bf16.msra.mxu1 %v3745_v41  ;;  %v1475_v41 = vsel %vm690_vm1, %v3811_v10, %v3827_v45 }
 0x30a   : > { %1769 = vst.msk [vmem:[#allocation3 + $0x58] sm:$0xff] %vm1255_vm10, %v1753_v49  ;;  %v1756_v50 = vsel %vm465_vm3, %v1749_v16, %v1751_v24  ;;  %v1757_v48 = vsel %vm465_vm3, %v1751_v24, %v1753_v49  ;;  %2523 = vmatmul.mubr.msk.bf16.vlgmr.msra.gmra.mrb[20].mxu0 %vm887_vm2, %v2690_v39  ;;  %1593 = vmatprep.subr.bf16.mxu1 %v1447_v11  ;;  %v1982_v16 = vld [vmem:[#allocation3 + $0x70] sm:$0xff] }
 0x30b   : > { %2042 = vmatpush1.bf16.msra.mxu0 %v3497_v55  ;;  %2073 = vmatprep.mubr.bf16.mxu0 %v2401_v3 }
 0x30c   : > { %2043 = vmatprep.subr.bf16.mxu0 %v3519_v1 }
 0x30d   : > { %v1781_v61 = vpop.permute.xlu1 %1780  ;;  %v1833_v4 = vpop.permute.xlu0 %1832  ;;  %1594 = vmatpush1.bf16.msra.mxu1 %v3690_v9 }
 0x30e   : > { %1797 = vst.msk [vmem:[#allocation3 + $0x88] sm:$0xff] %vm1255_vm10, %v1781_v61  ;;  %1595 = vmatprep.subr.bf16.mxu1 %v3741_v54 }
 0x30f   : > { %2044 = vmatpush1.bf16.msra.mxu0 %v3517_v38  ;;  %v1474_v38 = vsel %vm690_vm1, %v3819_v12, %v3811_v10  ;;  %v1994_v10 = vld [vmem:[#allocation3 + $0xd0] sm:$0xff] }
 0x310   : > { %2045 = vmatprep.subr.bf16.mxu0 %v1755_v52 }
 0x311   : > { %v1809_v62 = vpop.permute.xlu1 %1808  ;;  %v1779_v55 = vpop.permute.xlu0 %1778  ;;  %1596 = vmatpush1.bf16.msra.mxu1 %v3756_v60 }
 0x312   : > { %1825 = vst.msk [vmem:[#allocation3 + $0xb8] sm:$0xff] %vm1255_vm10, %v1809_v62  ;;  %v1784_v1 = vsel %vm494_vm5, %v1777_v36, %v1779_v55  ;;  %v1785_v9 = vsel %vm494_vm5, %v1779_v55, %v1781_v61  ;;  %1606 = vmatprep.subr.bf16.mxu1 %v1475_v41 }
 0x313   : > { %2046 = vmatpush1.bf16.msra.mxu0 %v3860_v5 }
 0x314   : > { %2047 = vmatprep.subr.bf16.mxu0 %v1757_v48  ;;  %1598 = vmatmul.mubr.bf16.vlgmr.msra.gmra.mrb[40].mxu1 %v2395_v13 }
 0x315   : > { %v1837_v54 = vpop.permute.xlu1 %1836  ;;  %v1859_v45 = vpop.permute.xlu0 %1858  ;;  %1607 = vmatpush1.bf16.msra.mxu1 %v1474_v38  ;;  %1638 = vmatprep.mubr.bf16.mxu1 %v2863_v6  ;;  %v1985_v8 = vld [vmem:[#allocation3 + $0x88] sm:$0xff]  ;;  %v2400_v38 = vcombine.low %v3894_v7, %v3894_v7 }
 0x316   : > { %1853 = vst.msk [vmem:[#allocation3 + $0xe8] sm:$0xff] %vm1255_vm10, %v1837_v54  ;;  %1878 = vst.msk [vmem:[#allocation3 + $0x100] sm:$0xff] %vm1255_vm10, %v1859_v45  ;;  %1608 = vmatprep.subr.bf16.mxu1 %v3763_v31 }
 0x317   : > { %2048 = vmatpush1.bf16.msra.mxu0 %v1756_v50  ;;  %v1988_v50 = vld [vmem:[#allocation3 + $0xa0] sm:$0xff] }
 0x318   : > { %2049 = vmatprep.subr.bf16.mxu0 %v3869_v46  ;;  %v1979_v46 = vld [vmem:[#allocation3 + $0x58] sm:$0xff] }
 0x319   : > { %v1805_v60 = vpop.permute.xlu1 %1804  ;;  %v1807_v58 = vpop.permute.xlu0 %1806  ;;  %1609 = vmatpush1.bf16.msra.mxu1 %v3699_v35 }
 0x31a   : > { %v1812_v12 = vsel %vm523_vm7, %v1805_v60, %v1807_v58  ;;  %v1813_v27 = vsel %vm523_vm7, %v1807_v58, %v1809_v62  ;;  %2481 = vmatprep.subr.bf16.mxu1 %v1994_v10 }
 0x31b   : > { %2050 = vmatpush1.bf16.msra.mxu0 %v3866_v19 }
 0x31c   : > { %2051 = vmatprep.subr.bf16.mxu0 %v1785_v9  ;;  %v1991_v9 = vld [vmem:[#allocation3 + $0xb8] sm:$0xff] }
 0x31d   : > { %v1857_v44 = vpop.permute.xlu1 %1856  ;;  %v1861_v2 = vpop.permute.xlu0 %1860  ;;  %v1997_v59 = vld [vmem:[#allocation3 + $0xe8] sm:$0xff]  ;;  %v2000_v32 = vld [vmem:[#allocation3 + $0x100] sm:$0xff] }
 0x31e   : > { %v1867_v31 = vsel %vm581_vm9, %v1857_v44, %v1859_v45 }
 0x31f   : > { %2052 = vmatpush1.bf16.msra.mxu0 %v1784_v1 }
 0x320   : > { %2053 = vmatprep.subr.bf16.mxu0 %v3886_v34  ;;  %2398 = vmatmul.mubr.msk.bf16.vlgmr.msra.gmra.mrb[40].mxu1 %vm887_vm2, %v2690_v39 }
 0x321   : > { %v1855_v35 = vpop.permute.xlu1 %1854  ;;  %v1835_v20 = vpop.permute.xlu0 %1834  ;;  %2482 = vmatpush3.bf16.msra.mxu1 %v1970_v63  ;;  %2155 = vmatprep.mubr.bf16.mxu1 %v2401_v3 }
 0x322   : > { %v1866_v57 = vsel %vm581_vm9, %v1855_v35, %v1857_v44  ;;  %v1840_v43 = vsel %vm552_vm8, %v1833_v4, %v1835_v20  ;;  %v1841_v53 = vsel %vm552_vm8, %v1835_v20, %v1837_v54  ;;  %2483 = vmatprep.subr.bf16.mxu1 %v1997_v59 }
 0x323   : > { %2054 = vmatpush1.bf16.msra.mxu0 %v3883_v37 }
 0x324   : > { %2055 = vmatprep.subr.bf16.mxu0 %v1813_v27 }
 0x325   : > { %v1865_v23 = vpop.permute.xlu1 %1864  ;;  %v1887_v0 = vpop.permute.xlu0 %1886  ;;  %2484 = vmatpush3.bf16.msra.mxu1 %v1973_v28 }
 0x326   : > { %1881 = vst.msk [vmem:[#allocation3 + $0x118] sm:$0xff] %vm1255_vm10, %v1865_v23  ;;  %1906 = vst.msk [vmem:[#allocation3 + $0x130] sm:$0xff] %vm1255_vm10, %v1887_v0  ;;  %2485 = vmatprep.subr.bf16.mxu1 %v2000_v32 }
 0x327   : > { %2056 = vmatpush1.bf16.msra.mxu0 %v1812_v12  ;;  %v2693_v12 = vld [vmem:[%s4081_s6 + $0x8] ss:$0 sps:$4 sm:$0xff]  }
 0x328   : > { %2057 = vmatprep.subr.bf16.mxu0 %v3902_v47 }
 0x329   : > { %v1885_v17 = vpop.permute.xlu1 %1884  ;;  %v1863_v26 = vpop.permute.xlu0 %1862  ;;  %2486 = vmatpush3.bf16.msra.mxu1 %v1976_v14 }
 0x32a   : > { %v1895_v18 = vsel %vm620_vm4, %v1885_v17, %v1887_v0  ;;  %v1868_v5 = vsel %vm581_vm9, %v1861_v2, %v1863_v26  ;;  %v1869_v52 = vsel %vm581_vm9, %v1863_v26, %v1865_v23 }
 0x32b   : > { %2058 = vmatpush1.bf16.msra.mxu0 %v3899_v22 }
 0x32c   : > { %2059 = vmatprep.subr.bf16.mxu0 %v1841_v53 }
 0x32d   : > { %v1883_v29 = vpop.permute.xlu1 %1882  ;;  %v1889_v30 = vpop.permute.xlu0 %1888  ;;  %v2003_v33 = vld [vmem:[#allocation3 + $0x118] sm:$0xff]  ;;  %v2006_v25 = vld [vmem:[#allocation3 + $0x130] sm:$0xff] }
 0x32e   : > { %v1894_v19 = vsel %vm620_vm4, %v1883_v29, %v1885_v17  ;;  %2487 = vmatprep.subr.bf16.mxu1 %v2003_v33 }
 0x32f   : > { %2060 = vmatpush1.bf16.msra.mxu0 %v1840_v43  ;;  %2488 = vmatpush3.bf16.msra.mxu1 %v1979_v46 }
 0x330   : > { %2061 = vmatprep.subr.bf16.mxu0 %v1867_v31  ;;  %2489 = vmatprep.subr.bf16.mxu1 %v2006_v25 }
 0x331   : > { %v1893_v13 = vpop.permute.xlu1 %1892  ;;  %v1891_v51 = vpop.permute.xlu0 %1890 }
 0x332   : > { %1909 = vst.msk [vmem:[#allocation3 + $0x148] sm:$0xff] %vm1255_vm10, %v1893_v13  ;;  %v1896_v15 = vsel %vm620_vm4, %v1889_v30, %v1891_v51  ;;  %v1897_v56 = vsel %vm620_vm4, %v1891_v51, %v1893_v13 }
 0x333   : > { %2062 = vmatpush1.bf16.msra.mxu0 %v1866_v57  ;;  %2490 = vmatpush3.bf16.msra.mxu1 %v1982_v16 }
 0x334   : > { %2063 = vmatprep.subr.bf16.mxu0 %v1869_v52 }
 0x335   : > { %v1913_v37 = vpop.permute.xlu1 %1912  ;;  %v1915_v34 = vpop.permute.xlu0 %1914 }
 0x336   : > { %v1923_v40 = vsel %vm655_vm6, %v1913_v37, %v1915_v34  ;;  %1934 = vst.msk [vmem:[#allocation3 + $0x160] sm:$0xff] %vm1255_vm10, %v1915_v34 }
 0x337   : > { %2064 = vmatpush1.bf16.msra.mxu0 %v1868_v5 }
 0x338   : > { %2065 = vmatprep.subr.bf16.mxu0 %v1895_v18 }
 0x339   : > { %v1911_v42 = vpop.permute.xlu1 %1910  ;;  %v1919_v36 = vpop.permute.xlu0 %1918  ;;  %v2009_v22 = vld [vmem:[#allocation3 + $0x148] sm:$0xff] }
 0x33a   : > { %v1922_v47 = vsel %vm655_vm6, %v1911_v42, %v1913_v37  ;;  %2491 = vmatprep.subr.bf16.mxu1 %v2009_v22 }
 0x33b   : > { %2066 = vmatpush1.bf16.msra.mxu0 %v1894_v19  ;;  %2492 = vmatpush3.bf16.msra.mxu1 %v1985_v8 }
 0x33c   : > { %2067 = vmatprep.subr.bf16.mxu0 %v1897_v56 }
 0x33d   : > { %v1921_v39 = vpop.permute.xlu1 %1920  ;;  %v1917_v3 = vpop.permute.xlu0 %1916  ;;  %v2012_v11 = vld [vmem:[#allocation3 + $0x160] sm:$0xff] }
 0x33e   : > { %v1925_v49 = vsel %vm655_vm6, %v1919_v36, %v1921_v39  ;;  %1937 = vst.msk [vmem:[#allocation3 + $0x178] sm:$0xff] %vm1255_vm10, %v1921_v39  ;;  %v1924_v24 = vsel %vm655_vm6, %v1917_v3, %v1919_v36  ;;  %2493 = vmatprep.subr.bf16.mxu1 %v2012_v11 }
 0x33f   : > { %2068 = vmatpush1.bf16.msra.mxu0 %v1896_v15  ;;  %2494 = vmatpush3.bf16.msra.mxu1 %v1988_v50 }
 0x340   : > { %2069 = vmatprep.subr.bf16.mxu0 %v1923_v40 }
 0x341   : > { %v1941_v48 = vpop.permute.xlu1 %1940  ;;  %v1943_v61 = vpop.permute.xlu0 %1942 }
 0x342   : > { %v1951_v4 = vsel %vm690_vm1, %v1941_v48, %v1943_v61  ;;  %1962 = vst.msk [vmem:[#allocation3 + $0x190] sm:$0xff] %vm1255_vm10, %v1943_v61 }
 0x343   : > { %2070 = vmatpush1.bf16.msra.mxu0 %v1922_v47 }
 0x344   : > { %2071 = vmatprep.subr.bf16.mxu0 %v1925_v49 }
 0x345   : > { %v1939_v41 = vpop.permute.xlu1 %1938  ;;  %v1947_v62 = vpop.permute.xlu0 %1946  ;;  %v2015_v55 = vld [vmem:[#allocation3 + $0x178] sm:$0xff] }
 0x346   : > { %v1950_v1 = vsel %vm690_vm1, %v1939_v41, %v1941_v48  ;;  %2495 = vmatprep.subr.bf16.mxu1 %v2015_v55 }
 0x347   : > { %2496 = vmatpush3.bf16.msra.mxu1 %v1991_v9  ;;  %2072 = vmatpush1.bf16.msra.mxu0 %v1924_v24 }
 0x348   : > { %2526 = vmatprep.subr.bf16.mxu1 %v2871_v21  ;;  %2082 = vmatprep.subr.bf16.mxu0 %v1951_v4 }
 0x349   : > { %v1949_v54 = vpop.permute.xlu1 %1948  ;;  %v1945_v45 = vpop.permute.xlu0 %1944  ;;  %v2018_v60 = vld [vmem:[#allocation3 + $0x190] sm:$0xff] }
 0x34a   : > { %v1953_v58 = vsel %vm690_vm1, %v1947_v62, %v1949_v54  ;;  %1965 = vst.msk [vmem:[#allocation3 + $0x1a8] sm:$0xff] %vm1255_vm10, %v1949_v54  ;;  %v1952_v10 = vsel %vm690_vm1, %v1945_v45, %v1947_v62  ;;  %2156 = vmatmul.mubr.bf16.vlgmr.msra.gmra.mrb[44].mxu1 %v2400_v38  ;;  %2074 = vmatmul.mubr.bf16.vlgmr.msra.gmra.mrb[24].mxu0 %v2400_v38 }
 0x34b   : > { %2527 = vmatpush3.bf16.msra.mxu1 %v2018_v60  ;;  %2083 = vmatpush1.bf16.msra.mxu0 %v1950_v1 }
 0x34c   : > { %2528 = vmatprep.subr.bf16.mxu1 %v2871_v21  ;;  %2084 = vmatprep.subr.bf16.mxu0 %v1953_v58 }
 0x34d   : > { %2530 = vmatprep.mubr.msk.bf16.mxu1 %vm2872_vm11, %v2871_v21  ;;  %2114 = vmatprep.mubr.bf16.mxu0 %v2863_v6 }
 0x34f   : > { %2085 = vmatpush1.bf16.msra.mxu0 %v1952_v10 }
 0x351   : > { %v2021_v7 = vld [vmem:[#allocation3 + $0x1a8] sm:$0xff] }
 0x352   : > { %2529 = vmatpush3.bf16.msra.mxu1 %v2021_v7 }
 0x355   : > { %2531 = vmatmul.mubr.msk.bf16.vlgmr.msra.gmra.mrb[48].mxu1 %vm887_vm2, %v2693_v12 }
 0x356   : > { %2403 = vmatmul.mubr.msk.bf16.vlgmr.msra.gmra.mrb[24].mxu0 %vm887_vm2, %v2693_v12 }
 0x35b   : > { %v1550_v6 = vpop.permute.xlu0 %1549 }
 0x3d5   : > { %v2472_v27 = vpop.f32.mrb[16].mxu0 }
 0x3d6   : > { %v2473_v44 = vpop.f32.mrb[17].mxu0 }
 0x3d7   : > { %v2474_v2 = vadd.f32 %v2473_v44, %v2472_v27  ;;  %v2475_v31 = vpop.f32.mrb[18].mxu0 }
 0x3d8   : > { %v2476_v21 = vpop.f32.mrb[19].mxu0 }
 0x3d9   : > { %v1682_v63 = vadd.f32 %v2474_v2, %v1550_v6 }
 0x3dd   : > { %v1721_v35 = vpop.f32.mrb[20].mxu0 }
 0x3de   : > { %v1722_v20 = vadd.f32 %v1721_v35, %v1682_v63  ;;  %v2524_v59 = vpop.f32.mrb[21].mxu0 }
 0x3df   : > { %v1724_v57 = vpop.f32.mrb[22].mxu0 }
 0x3e0   : > { %1729 = vst.msk [vmem:[%s397_s24 + $0x10] sm:$0xff] %vm1255_vm10, %v1722_v20  ;;  %v2525_v43 = vpop.f32.mrb[23].mxu0 }
 0x3f3   : > { %v1640_v53 = vpop.f32.mrb[40].mxu1 }
 0x3f4   : > { %v2566_v28 = vadd.f32 %v1640_v53, %v1550_v6  ;;  %v1642_v23 = vpop.f32.mrb[41].mxu1 }
 0x3f5   : > { %v2567_v0 = vadd.f32 %v1642_v23, %v1550_v6  ;;  %v1644_v32 = vpop.f32.mrb[42].mxu1 }
 0x3f6   : > { %1727 = vst [vmem:[%s397_s24] sm:$0xff] %v2566_v28  ;;  %v1645_v14 = vpop.f32.mrb[43].mxu1 }
 0x3f7   : > { %1728 = vst [vmem:[%s397_s24 + $0x8] sm:$0xff] %v2567_v0 }
 0x3f8   : > { %2765 = shalt.err (!%p2762_p7)
}
 0x3f9   : > { %s2766_s25 = scalar_lea.hbm %s3997_s29, 384  ;;  %s2770_s28 = scalar_lea.hbm %s4084_s9, 768 }
 0x3fa   : > { %p2767_p9 = scmp.ne.s32.totalorder %s3997_s29, %s2766_s25  ;;  %p2771_p5 = scmp.lt.u32.totalorder %s3997_s29, %s4084_s9 }
 0x3fb   : > { %p2772_p11 = scmp.lt.u32.totalorder %s2770_s28, %s2766_s25  ;;  %p2774_p4 = scmp.lt.u32.totalorder %s2766_s25, %s3997_s29 }
 0x3fc   : > { %p2768_p2 = pnand %p2767_p9, %p3024_p12 }
 0x3fd   : > { %p2773_p1 = por %p2772_p11, %p2771_p5 }
 0x3fe   : > { %p2769_p0 = pneg %p2768_p2 }
 0x3ff   : > { %p2775_p6 = por %p2774_p4, %p2773_p1 }
 0x401   : > { %p2776_p8 = pnand %p2775_p6, %p2769_p0 }
 0x403   : > { %2779 = shalt.err (!%p2776_p8)
}
 0x404   : > { %2587 = dma.vmem_to_hbm [thread:$0]  (%p3024_p12), %s3999_s20, 384, %s3997_s29, %s2212_s21   ;;  %v2026_v29 = vpop.permute.xlu1 %2025 }
 0x405   : > { %s2203_s26 = sld [smem:[#allocation4]]  ;;  %s404_s20 = scalar_lea.vmem [#allocation11], %s2578_s19 }
 0x406   : > { %s2245_s29 = sshll.u32 %s404_s20, 4  ;;  %s4031_s25 = scalar_lea.hbm %s4085_s10, %s2579_s30  ;;  %s4033_s29 = int_to_ptr.vmem [resolvable:$true] %s2245_s29 }
 0x407   : > { %s2217_s19 = scalar_lea.sflag [#allocation12], %s3072_s23  ;;  %s2780_s24 = scalar_lea.vmem %s4033_s29, 384 }
 0x408   : > { %p2781_p10 = scmp.ne.s32.totalorder %s4033_s29, %s2780_s24  ;;  %s2874_s27 = smov [#allocation11]  }
 0x409   : > { %s2784_s8 = sshll.u32 %s2874_s27, 4  ;;  %s2785_s8 = int_to_ptr.vmem [resolvable:$false] %s2784_s8 }
 0x40a   : > { %p2782_p13 = pnand %p2781_p10, %p3024_p12  ;;  %s2786_s28 = scalar_lea.vmem %s2785_s8, 768 }
 0x40b   : > { %v2204_v19 = vstv %s2203_s26  ;;  %p2787_p7 = scmp.lt.s32.totalorder %s4033_s29, %s2785_s8  ;;  %p2788_p9 = scmp.lt.s32.totalorder %s2786_s28, %s2780_s24 }
 0x40c   : > { %p2783_p3 = pneg %p2782_p13 }
 0x40d   : > { %p2789_p2 = por %p2788_p9, %p2787_p7 }
 0x40f   : > { %p2790_p0 = pnand %p2789_p2, %p2783_p3 }
 0x41d   : > { %v2497_v17 = vpop.f32.mrb[44].mxu1 }
 0x41e   : > { %v2498_v26 = vpop.f32.mrb[45].mxu1 }
 0x41f   : > { %v2499_v18 = vadd.f32 %v2498_v26, %v2497_v17  ;;  %v2500_v5 = vpop.f32.mrb[46].mxu1 }
 0x420   : > { %v2501_v52 = vpop.f32.mrb[47].mxu1 }
 0x421   : > { %v2158_v30 = vadd.f32 %v2499_v18, %v2026_v29 }
 0x428   : > { %v2197_v33 = vpop.f32.mrb[48].mxu1 }
 0x429   : > { %v2198_v46 = vadd.f32 %v2197_v33, %v2158_v30  ;;  %v2116_v25 = vpop.f32.mrb[24].mxu0  ;;  %v2532_v13 = vpop.f32.mrb[49].mxu1 }
 0x42a   : > { %v2568_v51 = vadd.f32 %v2116_v25, %v2026_v29  ;;  %v2118_v15 = vpop.f32.mrb[25].mxu0  ;;  %v2200_v56 = vpop.f32.mrb[50].mxu1 }
 0x42b   : > { %v2207_v16 = vmul.f32 %v2204_v19, %v2198_v46  ;;  %v2569_v37 = vadd.f32 %v2118_v15, %v2026_v29  ;;  %v2120_v34 = vpop.f32.mrb[26].mxu0  ;;  %v2533_v40 = vpop.f32.mrb[51].mxu1 }
 0x42c   : > { %v2205_v42 = vmul.f32 %v2568_v51, %v2204_v19  ;;  %v2121_v36 = vpop.f32.mrb[27].mxu0 }
 0x42d   : > { %2210 = vst.msk [vmem:[%s404_s20 + $0x10] sm:$0xff] %vm1255_vm10, %v2207_v16  ;;  %v2206_v22 = vmul.f32 %v2569_v37, %v2204_v19 }
 0x42e   : > { %2208 = vst [vmem:[%s404_s20] sm:$0xff] %v2205_v42 }
 0x42f   : > { %2209 = vst [vmem:[%s404_s20 + $0x8] sm:$0xff] %v2206_v22 }
 0x430   : > { %2793 = shalt.err (!%p2790_p0)
}
 0x431   : > { %s2794_s23 = scalar_lea.hbm %s4031_s25, 384  ;;  %s2798_s12 = scalar_lea.hbm %s4085_s10, 768 }
 0x432   : > { %p2795_p5 = scmp.ne.s32.totalorder %s4031_s25, %s2794_s23  ;;  %p2799_p4 = scmp.lt.u32.totalorder %s4031_s25, %s4085_s10 }
 0x433   : > { %p2800_p6 = scmp.lt.u32.totalorder %s2798_s12, %s2794_s23  ;;  %p2802_p10 = scmp.lt.u32.totalorder %s2794_s23, %s4031_s25 }
 0x434   : > { %p2796_p11 = pnand %p2795_p5, %p3024_p12 }
 0x435   : > { %p2801_p8 = por %p2800_p6, %p2799_p4 }
 0x436   : > { %p2797_p1 = pneg %p2796_p11 }
 0x437   : > { %p2803_p13 = por %p2802_p10, %p2801_p8 }
 0x439   : > { %p2804_p3 = pnand %p2803_p13, %p2797_p1 }
 0x43b   : > { %2807 = shalt.err (!%p2804_p3)
}
 0x43c   : > { %2588 = dma.vmem_to_hbm [thread:$0]  (%p3024_p12), %s4033_s29, 384, %s4031_s25, %s2217_s19  }
 0x43d PF: > { %s4111_s21 = sld [smem:[#allocation17_spill]]  ;;  %s2257_s11 = sand.u32 1, %s2842_s15  }
 0x43e   : > { %p4113_p9 = scmp.ge.s32.totalorder %s2854_s18, 2  ;;  %s2258_s24 = scalar_lea.sflag [#allocation7], %s2257_s11 }
 0x443   : > { %p4112_p7 = scmp.ne.s32.totalorder %s4111_s21, 0 }
 0x445   : > { %p2600_p2 = pnand %p4113_p9, %p4112_p7 }
 0x447   : > { %2833 = dma.done.wait (!%p2600_p2), %s2258_s24, 384  }
 0x448   : > { %2835 = vsyncadd (!%p2600_p2), %s2258_s24, 4294966912  ;;  %s2267_s27 = scalar_lea.sflag [#allocation12], %s2257_s11 }
 0x449   : > { %2837 = dma.done.wait (!%p2600_p2), %s2267_s27, 384  }
 0x44a   : > { %2839 = vsyncadd (!%p2600_p2), %s2267_s27, 4294966912  ;;  %s4114_s18 = sld [smem:[#allocation18_spill]]  ;;  %s4115_s15 = smov %s2846_s16 }
 0x44b   : > { %s4116_s16 = smov %s2850_s17  ;;  %s4117_s17 = smov %s3020_s13 }
 0x450   : > { %p29_p12 = scmp.ge.s32.totalorder %s4114_s18, 4  }
 0x452   :  { %31 = sbr.rel (!%p29_p12) target bundleno = 10 (0xa), region = 122 }
 0x459   :  { %2272 = vsyncpa [#allocation6], 1 }
 0x45a   :  { %2274 = vsyncpa [#allocation6 + $0x1], 1 }
 0x45b   :  { %2275 = vsyncpa [#allocation9], 1 }
 0x45c   :  { %2276 = vsyncpa [#allocation7], 1 }
 0x45d   :  { %2278 = vsyncpa [#allocation7 + $0x1], 1 }
 0x45e   :  { %2279 = vsyncpa [#allocation12], 1 }
 0x45f   :  { %2281 = vsyncpa [#allocation12 + $0x1], 1 }

</bundles_post_ra>
